<compile_context>
chip_gen: v7x
topology: tpu7x:2x2x1
jax: 0.10.0
libtpu: 0.0.40
codegen_flags: <defaults>
</compile_context>

<pallas_src>
import functools

import jax
import jax.numpy as jnp
from jax.experimental import pallas as pl
from jax.experimental.pallas import tpu as pltpu


def _round_up(n, m):
    return ((n + m - 1) // m) * m


_VMEM_BUDGET = 20 * 1024 * 1024   # conservative block budget (fits v7x 64 MiB/TC)
_VMEM_LIMIT = 32 * 1024 * 1024    # explicit scoped-VMEM limit for the pallas_calls


def _pick_chunk(t, bp, feat, hidden, max_chunk=64):
    """VMEM-aware time-chunk: budget the chunk-scaling blocks (x input and
    hidden output, double-buffered, plus the gates scratch) against a budget
    that is safe on v5e/v6e (128 MiB VMEM) and v7x (64 MiB per TensorCore)."""
    per_step = 4 * bp * (2 * feat + 2 * hidden + 4 * hidden)
    fixed = 4 * (2 * (feat + hidden) * 4 * hidden + 2 * bp * hidden) + (1 << 20)
    avail = max(_VMEM_BUDGET - fixed, per_step)
    return int(max(1, min(max_chunk, avail // per_step, t)))


# ----------------------------------------------------------------------------
# Optional single-buffering of grid-invariant weight blocks.  Probed once so an
# unsupported pipeline_mode can never break compilation on older runtimes.
# ----------------------------------------------------------------------------
_BUFFERED_OK = None


def _buffered_supported():
    global _BUFFERED_OK
    if _BUFFERED_OK is None:
        def _copy(x_ref, o_ref):
            o_ref[...] = x_ref[...]
        try:
            with jax.ensure_compile_time_eval():
                fn = pl.pallas_call(
                    _copy,
                    out_shape=jax.ShapeDtypeStruct((16, 128), jnp.float32),
                    grid=(2,),
                    in_specs=[pl.BlockSpec((8, 128), lambda i: (i, 0),
                                           pipeline_mode=pl.Buffered(1))],
                    out_specs=pl.BlockSpec((8, 128), lambda i: (i, 0)),
                )
                jax.block_until_ready(fn(jnp.zeros((16, 128), jnp.float32)))
            _BUFFERED_OK = True
        except Exception:   # pragma: no cover - depends on runtime support
            _BUFFERED_OK = False
    return _BUFFERED_OK


def _weight_spec(block_shape, index_map):
    """BlockSpec for a block that is (nearly) invariant across the grid: ask for
    a single VMEM buffer instead of the default double buffer when supported."""
    if _buffered_supported():
        return pl.BlockSpec(block_shape, index_map, pipeline_mode=pl.Buffered(1))
    return pl.BlockSpec(block_shape, index_map)


# ----------------------------------------------------------------------------
# Fused bidirectional LSTM layer: per (direction, time-chunk) grid step the
# kernel (a) projects the whole chunk's inputs to gates with ONE lane-dense
# GEMM held in VMEM scratch and (b) runs the sequential cell (h @ Whh only).
# Backward direction = reversed chunk index_map + reversed in-chunk order, so
# no x[::-1]/out[::-1] HBM copies exist anywhere.
# ----------------------------------------------------------------------------
def _bilstm_fused_kernel(x_ref, wih_ref, whh_ref, b_ref, out_ref,
                         g_ref, h_ref, c_ref, *,
                         chunk, hidden, nt, t_real, ragged):
    d = pl.program_id(0)               # 0 = forward, 1 = backward
    t = pl.program_id(1)               # time-chunk counter
    H = hidden
    Bp = h_ref.shape[0]

    @pl.when(t == 0)
    def _():                           # (re)start the recurrence for this direction
        h_ref[...] = jnp.zeros_like(h_ref)
        c_ref[...] = jnp.zeros_like(c_ref)

    wih = wih_ref[0]                   # (F, 4H)   resident for the chunk
    whh = whh_ref[0]                   # (H, 4H)   resident for the chunk
    bias = b_ref[0]                    # (1, 4H)

    # ---- fused input projection: (chunk*Bp, F) @ (F, 4H) + b, kept in VMEM ----
    g_ref[...] = (jnp.dot(x_ref[...], wih, preferred_element_type=jnp.float32)
                  + bias).reshape(chunk, Bp, 4 * H)

    base_t = ((1 - d) * t + d * (nt - 1 - t)) * chunk
    write_fused = (len(out_ref.shape) == 3)     # (chunk,Bp,H) vs (1,chunk,Bp,H)

    def cell(i, carry):
        h, c = carry
        i_eff = (1 - d) * i + d * (chunk - 1 - i)        # reversed for backward
        gates = g_ref[i_eff] + jnp.dot(h, whh, preferred_element_type=jnp.float32)
        # Full-width sigmoid over the lane-dense (Bp, 4H) tile via a single
        # tanh-form EUP pass; only the g-gate needs its own tanh.
        sg = 0.5 * jnp.tanh(0.5 * gates) + 0.5
        i_g = sg[:, 0 * H:1 * H]
        f_g = sg[:, 1 * H:2 * H]
        o_g = sg[:, 3 * H:4 * H]
        g_g = jnp.tanh(gates[:, 2 * H:3 * H])
        c_n = f_g * c + i_g * g_g
        h_n = o_g * jnp.tanh(c_n)
        if ragged:                       # static flag: mask padded time steps
            valid = (base_t + i_eff) < t_real
            h_n = jnp.where(valid, h_n, h)
            c_n = jnp.where(valid, c_n, c)
        if write_fused:
            out_ref[i_eff] = h_n
        else:
            out_ref[0, i_eff] = h_n
        return h_n, c_n

    h_fin, c_fin = jax.lax.fori_loop(0, chunk, cell, (h_ref[...], c_ref[...]),
                                     unroll=min(chunk, 8))
    h_ref[...] = h_fin
    c_ref[...] = c_fin


def bilstm_layer_pallas(x_tbd, wih_stack, whh_stack, bias_stack, hidden,
                        *, max_chunk=64):
    """x_tbd: (T, Bp, F); wih_stack: (2, F, 4H); whh_stack: (2, H, 4H);
    bias_stack: (2, 1, 4H).  Returns (T, Bp, 2H), [fwd | bwd] on the last axis."""
    T, Bp, F = x_tbd.shape
    H = hidden
    H4 = 4 * H
    chunk = _pick_chunk(T, Bp, F, H, max_chunk=max_chunk)
    Tp = _round_up(T, chunk)
    nt = Tp // chunk
    ragged = Tp != T
    if ragged:                                   # padded steps masked in-kernel
        x_tbd = jnp.pad(x_tbd, ((0, Tp - T), (0, 0), (0, 0)))
    x_flat = x_tbd.reshape(Tp * Bp, F).astype(jnp.float32)   # free reshape

    def data_chunk(d, t):                        # backward walks chunks in reverse
        return (1 - d) * t + d * (nt - 1 - t)

    fuse_out = (H % 128 == 0)                    # lane-dense direct [fwd|bwd] write
    if fuse_out:
        out_shape = jax.ShapeDtypeStruct((Tp, Bp, 2 * H), jnp.float32)
        out_spec = pl.BlockSpec((chunk, Bp, H),
                                lambda d, t: (data_chunk(d, t), 0, d))
    else:
        out_shape = jax.ShapeDtypeStruct((2, Tp, Bp, H), jnp.float32)
        out_spec = pl.BlockSpec((1, chunk, Bp, H),
                                lambda d, t: (d, data_chunk(d, t), 0, 0))

    kernel = functools.partial(_bilstm_fused_kernel, chunk=chunk, hidden=H,
                               nt=nt, t_real=T, ragged=ragged)

    out = pl.pallas_call(
        kernel,
        out_shape=out_shape,
        grid_spec=pltpu.PrefetchScalarGridSpec(
            num_scalar_prefetch=0,
            grid=(2, nt),
            in_specs=[
                pl.BlockSpec((chunk * Bp, F), lambda d, t: (data_chunk(d, t), 0)),
                _weight_spec((1, F, H4), lambda d, t: (d, 0, 0)),
                _weight_spec((1, H, H4), lambda d, t: (d, 0, 0)),
                _weight_spec((1, 1, H4), lambda d, t: (d, 0, 0)),
            ],
            out_specs=out_spec,
            scratch_shapes=[
                pltpu.VMEM((chunk, Bp, H4), jnp.float32),   # per-chunk gates
                pltpu.VMEM((Bp, H), jnp.float32),           # h carry
                pltpu.VMEM((Bp, H), jnp.float32),           # c carry
            ],
        ),
        compiler_params=pltpu.CompilerParams(
            # Direction axis shards across TensorCores on v7x; on 1-TC chips it
            # is a sequential outer loop.
            # TODO(synk): interleave the two direction chains inside one body
            # on v5e/v6e to hide MXU result-FIFO latency in the recurrence.
            dimension_semantics=("parallel", "arbitrary"),
            vmem_limit_bytes=_VMEM_LIMIT),
    )(x_flat, wih_stack.astype(jnp.float32), whh_stack.astype(jnp.float32),
      bias_stack.astype(jnp.float32))

    if fuse_out:
        return out[:T]
    return jnp.concatenate([out[0, :T], out[1, :T]], axis=-1)


# ----------------------------------------------------------------------------
# Final Linear: tiled, lane-dense GEMM (num_classes padded to 128 lanes inside
# the kernel and sliced back in JAX; rows tiled up to 512).
# ----------------------------------------------------------------------------
def _linear_kernel(x_ref, w_ref, b_ref, o_ref):
    o_ref[...] = (jnp.dot(x_ref[...], w_ref[...],
                          preferred_element_type=jnp.float32) + b_ref[...])


def linear_pallas(x2d, w, b, *, max_tile=512):
    """x2d: (N, F); w: (C, F) PyTorch layout; b: (C,).  Returns (N, C)."""
    N, F = x2d.shape
    C = w.shape[0]
    Cp = _round_up(C, 128)                                   # lane-dense stores
    wT = jnp.pad(jnp.transpose(w).astype(jnp.float32), ((0, 0), (0, Cp - C)))
    bp = jnp.pad(b.astype(jnp.float32), (0, Cp - C)).reshape(1, Cp)
    tile = min(max_tile, _round_up(N, 8))
    Np = _round_up(N, tile)
    xp = x2d if Np == N else jnp.pad(x2d, ((0, Np - N), (0, 0)))

    out = pl.pallas_call(
        _linear_kernel,
        out_shape=jax.ShapeDtypeStruct((Np, Cp), jnp.float32),
        grid_spec=pltpu.PrefetchScalarGridSpec(
            num_scalar_prefetch=0,
            grid=(Np // tile,),
            in_specs=[
                pl.BlockSpec((tile, F), lambda i: (i, 0)),
                _weight_spec((F, Cp), lambda i: (0, 0)),
                _weight_spec((1, Cp), lambda i: (0, 0)),
            ],
            out_specs=pl.BlockSpec((tile, Cp), lambda i: (i, 0)),
        ),
        compiler_params=pltpu.CompilerParams(
            dimension_semantics=("parallel",),
            vmem_limit_bytes=_VMEM_LIMIT),
    )(xp.astype(jnp.float32), wT, bp)
    return out[:N, :C]


# ----------------------------------------------------------------------------
# Pure-JAX reference (correctness check only).
# ----------------------------------------------------------------------------
def lstm_direction_ref(x_tbd, w_ih, w_hh, b_ih, b_hh):
    H = w_hh.shape[1]
    B = x_tbd.shape[1]

    def step(carry, x_t):
        h, c = carry
        gg = x_t @ w_ih.T + h @ w_hh.T + b_ih + b_hh
        i = jax.nn.sigmoid(gg[:, :H])
        f = jax.nn.sigmoid(gg[:, H:2 * H])
        g = jnp.tanh(gg[:, 2 * H:3 * H])
        o = jax.nn.sigmoid(gg[:, 3 * H:])
        c = f * c + i * g
        h = o * jnp.tanh(c)
        return (h, c), h

    init = (jnp.zeros((B, H), jnp.float32), jnp.zeros((B, H), jnp.float32))
    _, hs = jax.lax.scan(step, init, x_tbd.astype(jnp.float32))
    return hs


# ----------------------------------------------------------------------------
# Full LSTM1.forward (is_lstm=True branch).
# ----------------------------------------------------------------------------
def lstm1_forward(params, x, labels, class_weights, num_layers, hidden_dim,
                  *, use_pallas=True, max_chunk=64):
    # TODO(synk): nn.Dropout(p=0.5) is stochastic at train time; eval-mode
    # identity is used here (same as module.eval()).
    B, T, _ = x.shape
    x = x.astype(jnp.float32)

    if use_pallas:
        Bp = _round_up(max(B, 8), 8)                         # fill sublanes
        xp = jnp.pad(x, ((0, Bp - B), (0, 0), (0, 0)))
        layer_in = jnp.transpose(xp, (1, 0, 2))              # (T, Bp, D)
        for l in range(num_layers):
            p = params["lstm"][l]
            wih = jnp.stack([p["w_ih_f"].T, p["w_ih_b"].T], 0)          # (2,in,4H)
            whh = jnp.stack([p["w_hh_f"].T, p["w_hh_b"].T], 0)          # (2,H,4H)
            bia = jnp.stack([(p["b_ih_f"] + p["b_hh_f"])[None, :],
                             (p["b_ih_b"] + p["b_hh_b"])[None, :]], 0)  # (2,1,4H)
            layer_in = bilstm_layer_pallas(layer_in, wih, whh, bia, hidden_dim,
                                           max_chunk=max_chunk)          # (T,Bp,2H)
        # Classifier on the (T*Bp, 2H)-ordered activation; only the small
        # (T, B, C) logits get transposed, never the large activation.
        logits_tb = linear_pallas(layer_in.reshape(T * Bp, 2 * hidden_dim),
                                  params["fc_w"], params["fc_b"])
        logits = jnp.transpose(logits_tb.reshape(T, Bp, -1)[:, :B], (1, 0, 2))
    else:
        layer_in = jnp.transpose(x, (1, 0, 2))                           # (T,B,D)
        for l in range(num_layers):
            p = params["lstm"][l]
            fwd = lstm_direction_ref(layer_in, p["w_ih_f"], p["w_hh_f"],
                                     p["b_ih_f"], p["b_hh_f"])
            bwd = lstm_direction_ref(layer_in[::-1], p["w_ih_b"], p["w_hh_b"],
                                     p["b_ih_b"], p["b_hh_b"])[::-1]
            layer_in = jnp.concatenate([fwd, bwd], axis=-1)
        out = jnp.transpose(layer_in, (1, 0, 2))
        logits = (out.reshape(B * T, 2 * hidden_dim) @ params["fc_w"].T
                  + params["fc_b"]).reshape(B, T, -1)

    # y_hat = transpose(out, 1, 2) -> (B, C, T); CrossEntropyLoss(weight,
    # reduction='mean') = sum(w_n * nll_n) / sum(w_n).
    logp = jax.nn.log_softmax(logits, axis=-1)
    lab = labels.astype(jnp.int32)
    picked = jnp.take_along_axis(logp, lab[..., None], axis=-1)[..., 0]
    w = class_weights[lab]
    loss = -(w * picked).sum() / w.sum()
    pred = jnp.argmax(logits, axis=-1)
    return pred, loss, logits


# ----------------------------------------------------------------------------
# Deterministic parameter init (PyTorch-style uniform(-1/sqrt(H), 1/sqrt(H))).
# ----------------------------------------------------------------------------
def init_params(key, input_dim, hidden_dim, num_layers, num_classes):
    bound = 1.0 / (hidden_dim ** 0.5)
    keys = iter(jax.random.split(key, 8 * num_layers + 2))

    def u(shape, b=bound):
        return jax.random.uniform(next(keys), shape, jnp.float32, -b, b)

    layers = []
    for l in range(num_layers):
        in_dim = input_dim if l == 0 else 2 * hidden_dim
        layers.append({
            "w_ih_f": u((4 * hidden_dim, in_dim)),
            "w_hh_f": u((4 * hidden_dim, hidden_dim)),
            "b_ih_f": u((4 * hidden_dim,)),
            "b_hh_f": u((4 * hidden_dim,)),
            "w_ih_b": u((4 * hidden_dim, in_dim)),
            "w_hh_b": u((4 * hidden_dim, hidden_dim)),
            "b_ih_b": u((4 * hidden_dim,)),
            "b_hh_b": u((4 * hidden_dim,)),
        })
    fc_bound = 1.0 / ((2 * hidden_dim) ** 0.5)
    fc_w = u((num_classes, 2 * hidden_dim), fc_bound)
    fc_b = u((num_classes,), fc_bound)
    return {"lstm": layers, "fc_w": fc_w, "fc_b": fc_b}


if __name__ == "__main__":
    # Small shapes consistent with the module: batch=2, seq=8, input_dim=16,
    # hidden_dim=32, num_layers=2, num_classes=4.
    B, T, D, H, L, C = 2, 8, 16, 32, 2, 4
    key = jax.random.PRNGKey(0)
    k_x, k_lab, k_p = jax.random.split(key, 3)

    x = jax.random.normal(k_x, (B, T, D), jnp.float32)
    labels = jax.random.randint(k_lab, (B, T), 0, C)
    class_weights = jnp.array([1.0, 2.0, 0.5, 1.5], jnp.float32)
    params = init_params(k_p, D, H, L, C)

    pred, loss, logits = lstm1_forward(params, x, labels, class_weights, L, H,
                                       use_pallas=True)
    jax.block_until_ready((pred, loss, logits))

    # Correctness check against the pure-JAX reference implementation.
    pred_r, loss_r, logits_r = lstm1_forward(params, x, labels, class_weights,
                                             L, H, use_pallas=False)
    assert jnp.allclose(logits, logits_r, atol=1e-4, rtol=1e-4)
    assert jnp.allclose(loss, loss_r, atol=1e-4, rtol=1e-4)
    assert bool(jnp.all(jnp.isfinite(loss)))

    # Also exercise the multi-chunk + ragged-time path (chunk=3 over T=8).
    _, loss2, logits2 = lstm1_forward(params, x, labels, class_weights, L, H,
                                      use_pallas=True, max_chunk=3)
    jax.block_until_ready(logits2)
    assert jnp.allclose(logits2, logits_r, atol=1e-4, rtol=1e-4)
    assert jnp.allclose(loss2, loss_r, atol=1e-4, rtol=1e-4)

    print("KERNEL_OK")
</pallas_src>

<mosaic_0001>
module attributes {stable_mosaic.version = 11 : i64} {
  func.func @_copy(%arg0: i32, %arg1: memref<8x128xf32, #tpu.memory_space<vmem>>, %arg2: memref<8x128xf32, #tpu.memory_space<vmem>>) attributes {dimension_semantics = [#tpu.dimension_semantics<arbitrary>], iteration_bounds = array<i64: 2>, scalar_prefetch = 0 : i64, scratch_operands = 0 : i64, tpu.core_type = #tpu.core_type<tc>, window_params = [{pipeline_mode = #tpu.pipeline_mode<synchronous>, transform_indices = @transform_0, window_bounds = array<i64: 8, 128>}, {transform_indices = @transform_1, window_bounds = array<i64: 8, 128>}]} {
    %c0 = arith.constant 0 : index
    %c0_0 = arith.constant 0 : index
    %0 = vector.load %arg1[%c0, %c0_0] : memref<8x128xf32, #tpu.memory_space<vmem>>, vector<8x128xf32>
    %c0_1 = arith.constant 0 : index
    %c0_2 = arith.constant 0 : index
    %1 = vector.load %arg2[%c0_1, %c0_2] : memref<8x128xf32, #tpu.memory_space<vmem>>, vector<8x128xf32>
    tpu.vector_store %arg2[%c0_1, %c0_2], %0 {strides = array<i32>} : memref<8x128xf32, #tpu.memory_space<vmem>>, vector<8x128xf32>,
    return
  }
  func.func @transform_0(%arg0: i32) -> (i32, i32) {
    %c0_i32 = arith.constant 0 : i32
    %c0_i32_0 = arith.constant 0 : i32
    return %arg0, %c0_i32 : i32, i32
  }
  func.func @transform_1(%arg0: i32) -> (i32, i32) {
    %c0_i32 = arith.constant 0 : i32
    %c0_i32_0 = arith.constant 0 : i32
    return %arg0, %c0_i32 : i32, i32
  }
}

module attributes {stable_mosaic.version = 11 : i64} {
  func.func @_bilstm_fused_kernel(%arg0: i32, %arg1: i32, %arg2: memref<64x16xf32, #tpu.memory_space<vmem>>, %arg3: memref<1x16x128xf32, #tpu.memory_space<vmem>>, %arg4: memref<1x32x128xf32, #tpu.memory_space<vmem>>, %arg5: memref<1x1x128xf32, #tpu.memory_space<vmem>>, %arg6: memref<1x8x8x32xf32, #tpu.memory_space<vmem>>, %arg7: memref<8x8x128xf32, #tpu.memory_space<vmem>>, %arg8: memref<8x32xf32, #tpu.memory_space<vmem>>, %arg9: memref<8x32xf32, #tpu.memory_space<vmem>>) attributes {dimension_semantics = [#tpu.dimension_semantics<parallel>, #tpu.dimension_semantics<arbitrary>], iteration_bounds = array<i64: 2, 1>, scalar_prefetch = 0 : i64, scratch_operands = 3 : i64, tpu.core_type = #tpu.core_type<tc>, window_params = [{transform_indices = @transform_0, window_bounds = array<i64: 64, 16>}, {transform_indices = @transform_1, window_bounds = array<i64: 1, 16, 128>}, {transform_indices = @transform_2, window_bounds = array<i64: 1, 32, 128>}, {transform_indices = @transform_3, window_bounds = array<i64: 1, 1, 128>}, {transform_indices = @transform_4, window_bounds = array<i64: 1, 8, 8, 32>}]} {
    %c0_i32 = arith.constant 0 : i32
    %0 = arith.cmpi eq, %arg1, %c0_i32 : i32
    %1 = arith.extui %0 : i1 to i32
    %c0_i32_0 = arith.constant 0 : i32
    %2 = arith.cmpi ne, %1, %c0_i32_0 : i32
    scf.if %2 {
      %cst_111 = arith.constant 0.000000e+00 : f32
      %267 = vector.broadcast %cst_111 : f32 to vector<8x32xf32>
      %c0_112 = arith.constant 0 : index
      %c0_113 = arith.constant 0 : index
      %268 = vector.load %arg8[%c0_112, %c0_113] : memref<8x32xf32, #tpu.memory_space<vmem>>, vector<8x32xf32>
      tpu.vector_store %arg8[%c0_112, %c0_113], %267 {strides = array<i32>} : memref<8x32xf32, #tpu.memory_space<vmem>>, vector<8x32xf32>,
      %cst_114 = arith.constant 0.000000e+00 : f32
      %269 = vector.broadcast %cst_114 : f32 to vector<8x32xf32>
      %c0_115 = arith.constant 0 : index
      %c0_116 = arith.constant 0 : index
      %270 = vector.load %arg9[%c0_115, %c0_116] : memref<8x32xf32, #tpu.memory_space<vmem>>, vector<8x32xf32>
      tpu.vector_store %arg9[%c0_115, %c0_116], %269 {strides = array<i32>} : memref<8x32xf32, #tpu.memory_space<vmem>>, vector<8x32xf32>,
    } else {
    }
    %c0 = arith.constant 0 : index
    %c0_1 = arith.constant 0 : index
    %c0_2 = arith.constant 0 : index
    %3 = vector.load %arg3[%c0, %c0_1, %c0_2] : memref<1x16x128xf32, #tpu.memory_space<vmem>>, vector<1x16x128xf32>
    %4 = vector.shape_cast %3 : vector<1x16x128xf32> to vector<16x128xf32>
    %c0_3 = arith.constant 0 : index
    %c0_4 = arith.constant 0 : index
    %c0_5 = arith.constant 0 : index
    %5 = vector.load %arg4[%c0_3, %c0_4, %c0_5] : memref<1x32x128xf32, #tpu.memory_space<vmem>>, vector<1x32x128xf32>
    %6 = vector.shape_cast %5 : vector<1x32x128xf32> to vector<32x128xf32>
    %c0_6 = arith.constant 0 : index
    %c0_7 = arith.constant 0 : index
    %c0_8 = arith.constant 0 : index
    %7 = vector.load %arg5[%c0_6, %c0_7, %c0_8] : memref<1x1x128xf32, #tpu.memory_space<vmem>>, vector<1x1x128xf32>
    %8 = vector.shape_cast %7 : vector<1x1x128xf32> to vector<1x128xf32>
    %c0_9 = arith.constant 0 : index
    %c0_10 = arith.constant 0 : index
    %9 = vector.load %arg2[%c0_9, %c0_10] : memref<64x16xf32, #tpu.memory_space<vmem>>, vector<64x16xf32>
    %cst = arith.constant dense<0.000000e+00> : vector<64x128xf32>
    %10 = tpu.matmul %9, %4, %cst {dimension_numbers = #tpu.dot_dimension_numbers<[1], [0], [0], [1], [0, 0, 1, 1], [], []>} : vector<64x16xf32>, vector<16x128xf32>, vector<64x128xf32> -> vector<64x128xf32>
    %11 = vector.broadcast %8 : vector<1x128xf32> to vector<64x128xf32>
    %12 = arith.addf %10, %11 : vector<64x128xf32>
    %13 = vector.shape_cast %12 : vector<64x128xf32> to vector<8x8x128xf32>
    %c0_11 = arith.constant 0 : index
    %c0_12 = arith.constant 0 : index
    %c0_13 = arith.constant 0 : index
    %14 = vector.load %arg7[%c0_11, %c0_12, %c0_13] : memref<8x8x128xf32, #tpu.memory_space<vmem>>, vector<8x8x128xf32>
    tpu.vector_store %arg7[%c0_11, %c0_12, %c0_13], %13 {strides = array<i32>} : memref<8x8x128xf32, #tpu.memory_space<vmem>>, vector<8x8x128xf32>,
    %c0_14 = arith.constant 0 : index
    %c0_15 = arith.constant 0 : index
    %15 = vector.load %arg8[%c0_14, %c0_15] : memref<8x32xf32, #tpu.memory_space<vmem>>, vector<8x32xf32>
    %c0_16 = arith.constant 0 : index
    %c0_17 = arith.constant 0 : index
    %16 = vector.load %arg9[%c0_16, %c0_17] : memref<8x32xf32, #tpu.memory_space<vmem>>, vector<8x32xf32>
    %c0_i32_18 = arith.constant 0 : i32
    %c1_i32 = arith.constant 1 : i32
    %17 = arith.subi %c1_i32, %arg0 : i32
    %18 = arith.muli %17, %c0_i32_18 : i32
    %c7_i32 = arith.constant 7 : i32
    %19 = arith.subi %c7_i32, %c0_i32_18 : i32
    %20 = arith.muli %arg0, %19 : i32
    %21 = arith.addi %18, %20 : i32
    %22 = arith.index_cast %21 : i32 to index
    %c0_19 = arith.constant 0 : index
    %c0_20 = arith.constant 0 : index
    %23 = vector.load %arg7[%22, %c0_19, %c0_20] : memref<8x8x128xf32, #tpu.memory_space<vmem>>, vector<1x8x128xf32>
    %24 = vector.shape_cast %23 : vector<1x8x128xf32> to vector<8x128xf32>
    %cst_21 = arith.constant dense<0.000000e+00> : vector<8x128xf32>
    %25 = tpu.matmul %15, %6, %cst_21 {dimension_numbers = #tpu.dot_dimension_numbers<[1], [0], [0], [1], [0, 0, 1, 1], [], []>} : vector<8x32xf32>, vector<32x128xf32>, vector<8x128xf32> -> vector<8x128xf32>
    %26 = arith.addf %24, %25 : vector<8x128xf32>
    %cst_22 = arith.constant 5.000000e-01 : f32
    %27 = vector.broadcast %cst_22 : f32 to vector<8x128xf32>
    %28 = arith.mulf %27, %26 : vector<8x128xf32>
    %29 = math.tanh %28 : vector<8x128xf32>
    %cst_23 = arith.constant 5.000000e-01 : f32
    %30 = vector.broadcast %cst_23 : f32 to vector<8x128xf32>
    %31 = arith.mulf %30, %29 : vector<8x128xf32>
    %cst_24 = arith.constant 5.000000e-01 : f32
    %32 = vector.broadcast %cst_24 : f32 to vector<8x128xf32>
    %33 = arith.addf %31, %32 : vector<8x128xf32>
    %34 = vector.extract_strided_slice %33 {offsets = [0, 0], sizes = [8, 32], strides = [1, 1]} : vector<8x128xf32> to vector<8x32xf32>
    %35 = vector.extract_strided_slice %33 {offsets = [0, 32], sizes = [8, 32], strides = [1, 1]} : vector<8x128xf32> to vector<8x32xf32>
    %36 = vector.extract_strided_slice %33 {offsets = [0, 96], sizes = [8, 32], strides = [1, 1]} : vector<8x128xf32> to vector<8x32xf32>
    %37 = vector.extract_strided_slice %26 {offsets = [0, 64], sizes = [8, 32], strides = [1, 1]} : vector<8x128xf32> to vector<8x32xf32>
    %38 = math.tanh %37 : vector<8x32xf32>
    %39 = arith.mulf %35, %16 : vector<8x32xf32>
    %40 = arith.mulf %34, %38 : vector<8x32xf32>
    %41 = arith.addf %39, %40 : vector<8x32xf32>
    %42 = math.tanh %41 : vector<8x32xf32>
    %43 = arith.mulf %36, %42 : vector<8x32xf32>
    %c0_25 = arith.constant 0 : index
    %44 = arith.index_cast %21 : i32 to index
    %c0_26 = arith.constant 0 : index
    %c0_27 = arith.constant 0 : index
    %45 = vector.load %arg6[%c0_25, %44, %c0_26, %c0_27] : memref<1x8x8x32xf32, #tpu.memory_space<vmem>>, vector<1x1x8x32xf32>
    %46 = vector.shape_cast %45 : vector<1x1x8x32xf32> to vector<8x32xf32>
    %47 = vector.shape_cast %43 : vector<8x32xf32> to vector<1x1x8x32xf32>
    tpu.vector_store %arg6[%c0_25, %44, %c0_26, %c0_27], %47 {strides = array<i32>} : memref<1x8x8x32xf32, #tpu.memory_space<vmem>>, vector<1x1x8x32xf32>,
    %c1_i32_28 = arith.constant 1 : i32
    %c1_i32_29 = arith.constant 1 : i32
    %48 = arith.subi %c1_i32_29, %arg0 : i32
    %49 = arith.muli %48, %c1_i32_28 : i32
    %c7_i32_30 = arith.constant 7 : i32
    %50 = arith.subi %c7_i32_30, %c1_i32_28 : i32
    %51 = arith.muli %arg0, %50 : i32
    %52 = arith.addi %49, %51 : i32
    %53 = arith.index_cast %52 : i32 to index
    %c0_31 = arith.constant 0 : index
    %c0_32 = arith.constant 0 : index
    %54 = vector.load %arg7[%53, %c0_31, %c0_32] : memref<8x8x128xf32, #tpu.memory_space<vmem>>, vector<1x8x128xf32>
    %55 = vector.shape_cast %54 : vector<1x8x128xf32> to vector<8x128xf32>
    %cst_33 = arith.constant dense<0.000000e+00> : vector<8x128xf32>
    %56 = tpu.matmul %43, %6, %cst_33 {dimension_numbers = #tpu.dot_dimension_numbers<[1], [0], [0], [1], [0, 0, 1, 1], [], []>} : vector<8x32xf32>, vector<32x128xf32>, vector<8x128xf32> -> vector<8x128xf32>
    %57 = arith.addf %55, %56 : vector<8x128xf32>
    %cst_34 = arith.constant 5.000000e-01 : f32
    %58 = vector.broadcast %cst_34 : f32 to vector<8x128xf32>
    %59 = arith.mulf %58, %57 : vector<8x128xf32>
    %60 = math.tanh %59 : vector<8x128xf32>
    %cst_35 = arith.constant 5.000000e-01 : f32
    %61 = vector.broadcast %cst_35 : f32 to vector<8x128xf32>
    %62 = arith.mulf %61, %60 : vector<8x128xf32>
    %cst_36 = arith.constant 5.000000e-01 : f32
    %63 = vector.broadcast %cst_36 : f32 to vector<8x128xf32>
    %64 = arith.addf %62, %63 : vector<8x128xf32>
    %65 = vector.extract_strided_slice %64 {offsets = [0, 0], sizes = [8, 32], strides = [1, 1]} : vector<8x128xf32> to vector<8x32xf32>
    %66 = vector.extract_strided_slice %64 {offsets = [0, 32], sizes = [8, 32], strides = [1, 1]} : vector<8x128xf32> to vector<8x32xf32>
    %67 = vector.extract_strided_slice %64 {offsets = [0, 96], sizes = [8, 32], strides = [1, 1]} : vector<8x128xf32> to vector<8x32xf32>
    %68 = vector.extract_strided_slice %57 {offsets = [0, 64], sizes = [8, 32], strides = [1, 1]} : vector<8x128xf32> to vector<8x32xf32>
    %69 = math.tanh %68 : vector<8x32xf32>
    %70 = arith.mulf %66, %41 : vector<8x32xf32>
    %71 = arith.mulf %65, %69 : vector<8x32xf32>
    %72 = arith.addf %70, %71 : vector<8x32xf32>
    %73 = math.tanh %72 : vector<8x32xf32>
    %74 = arith.mulf %67, %73 : vector<8x32xf32>
    %c0_37 = arith.constant 0 : index
    %75 = arith.index_cast %52 : i32 to index
    %c0_38 = arith.constant 0 : index
    %c0_39 = arith.constant 0 : index
    %76 = vector.load %arg6[%c0_37, %75, %c0_38, %c0_39] : memref<1x8x8x32xf32, #tpu.memory_space<vmem>>, vector<1x1x8x32xf32>
    %77 = vector.shape_cast %76 : vector<1x1x8x32xf32> to vector<8x32xf32>
    %78 = vector.shape_cast %74 : vector<8x32xf32> to vector<1x1x8x32xf32>
    tpu.vector_store %arg6[%c0_37, %75, %c0_38, %c0_39], %78 {strides = array<i32>} : memref<1x8x8x32xf32, #tpu.memory_space<vmem>>, vector<1x1x8x32xf32>,
    %c2_i32 = arith.constant 2 : i32
    %c1_i32_40 = arith.constant 1 : i32
    %79 = arith.subi %c1_i32_40, %arg0 : i32
    %80 = arith.muli %79, %c2_i32 : i32
    %c7_i32_41 = arith.constant 7 : i32
    %81 = arith.subi %c7_i32_41, %c2_i32 : i32
    %82 = arith.muli %arg0, %81 : i32
    %83 = arith.addi %80, %82 : i32
    %84 = arith.index_cast %83 : i32 to index
    %c0_42 = arith.constant 0 : index
    %c0_43 = arith.constant 0 : index
    %85 = vector.load %arg7[%84, %c0_42, %c0_43] : memref<8x8x128xf32, #tpu.memory_space<vmem>>, vector<1x8x128xf32>
    %86 = vector.shape_cast %85 : vector<1x8x128xf32> to vector<8x128xf32>
    %cst_44 = arith.constant dense<0.000000e+00> : vector<8x128xf32>
    %87 = tpu.matmul %74, %6, %cst_44 {dimension_numbers = #tpu.dot_dimension_numbers<[1], [0], [0], [1], [0, 0, 1, 1], [], []>} : vector<8x32xf32>, vector<32x128xf32>, vector<8x128xf32> -> vector<8x128xf32>
    %88 = arith.addf %86, %87 : vector<8x128xf32>
    %cst_45 = arith.constant 5.000000e-01 : f32
    %89 = vector.broadcast %cst_45 : f32 to vector<8x128xf32>
    %90 = arith.mulf %89, %88 : vector<8x128xf32>
    %91 = math.tanh %90 : vector<8x128xf32>
    %cst_46 = arith.constant 5.000000e-01 : f32
    %92 = vector.broadcast %cst_46 : f32 to vector<8x128xf32>
    %93 = arith.mulf %92, %91 : vector<8x128xf32>
    %cst_47 = arith.constant 5.000000e-01 : f32
    %94 = vector.broadcast %cst_47 : f32 to vector<8x128xf32>
    %95 = arith.addf %93, %94 : vector<8x128xf32>
    %96 = vector.extract_strided_slice %95 {offsets = [0, 0], sizes = [8, 32], strides = [1, 1]} : vector<8x128xf32> to vector<8x32xf32>
    %97 = vector.extract_strided_slice %95 {offsets = [0, 32], sizes = [8, 32], strides = [1, 1]} : vector<8x128xf32> to vector<8x32xf32>
    %98 = vector.extract_strided_slice %95 {offsets = [0, 96], sizes = [8, 32], strides = [1, 1]} : vector<8x128xf32> to vector<8x32xf32>
    %99 = vector.extract_strided_slice %88 {offsets = [0, 64], sizes = [8, 32], strides = [1, 1]} : vector<8x128xf32> to vector<8x32xf32>
    %100 = math.tanh %99 : vector<8x32xf32>
    %101 = arith.mulf %97, %72 : vector<8x32xf32>
    %102 = arith.mulf %96, %100 : vector<8x32xf32>
    %103 = arith.addf %101, %102 : vector<8x32xf32>
    %104 = math.tanh %103 : vector<8x32xf32>
    %105 = arith.mulf %98, %104 : vector<8x32xf32>
    %c0_48 = arith.constant 0 : index
    %106 = arith.index_cast %83 : i32 to index
    %c0_49 = arith.constant 0 : index
    %c0_50 = arith.constant 0 : index
    %107 = vector.load %arg6[%c0_48, %106, %c0_49, %c0_50] : memref<1x8x8x32xf32, #tpu.memory_space<vmem>>, vector<1x1x8x32xf32>
    %108 = vector.shape_cast %107 : vector<1x1x8x32xf32> to vector<8x32xf32>
    %109 = vector.shape_cast %105 : vector<8x32xf32> to vector<1x1x8x32xf32>
    tpu.vector_store %arg6[%c0_48, %106, %c0_49, %c0_50], %109 {strides = array<i32>} : memref<1x8x8x32xf32, #tpu.memory_space<vmem>>, vector<1x1x8x32xf32>,
    %c3_i32 = arith.constant 3 : i32
    %c1_i32_51 = arith.constant 1 : i32
    %110 = arith.subi %c1_i32_51, %arg0 : i32
    %111 = arith.muli %110, %c3_i32 : i32
    %c7_i32_52 = arith.constant 7 : i32
    %112 = arith.subi %c7_i32_52, %c3_i32 : i32
    %113 = arith.muli %arg0, %112 : i32
    %114 = arith.addi %111, %113 : i32
    %115 = arith.index_cast %114 : i32 to index
    %c0_53 = arith.constant 0 : index
    %c0_54 = arith.constant 0 : index
    %116 = vector.load %arg7[%115, %c0_53, %c0_54] : memref<8x8x128xf32, #tpu.memory_space<vmem>>, vector<1x8x128xf32>
    %117 = vector.shape_cast %116 : vector<1x8x128xf32> to vector<8x128xf32>
    %cst_55 = arith.constant dense<0.000000e+00> : vector<8x128xf32>
    %118 = tpu.matmul %105, %6, %cst_55 {dimension_numbers = #tpu.dot_dimension_numbers<[1], [0], [0], [1], [0, 0, 1, 1], [], []>} : vector<8x32xf32>, vector<32x128xf32>, vector<8x128xf32> -> vector<8x128xf32>
    %119 = arith.addf %117, %118 : vector<8x128xf32>
    %cst_56 = arith.constant 5.000000e-01 : f32
    %120 = vector.broadcast %cst_56 : f32 to vector<8x128xf32>
    %121 = arith.mulf %120, %119 : vector<8x128xf32>
    %122 = math.tanh %121 : vector<8x128xf32>
    %cst_57 = arith.constant 5.000000e-01 : f32
    %123 = vector.broadcast %cst_57 : f32 to vector<8x128xf32>
    %124 = arith.mulf %123, %122 : vector<8x128xf32>
    %cst_58 = arith.constant 5.000000e-01 : f32
    %125 = vector.broadcast %cst_58 : f32 to vector<8x128xf32>
    %126 = arith.addf %124, %125 : vector<8x128xf32>
    %127 = vector.extract_strided_slice %126 {offsets = [0, 0], sizes = [8, 32], strides = [1, 1]} : vector<8x128xf32> to vector<8x32xf32>
    %128 = vector.extract_strided_slice %126 {offsets = [0, 32], sizes = [8, 32], strides = [1, 1]} : vector<8x128xf32> to vector<8x32xf32>
    %129 = vector.extract_strided_slice %126 {offsets = [0, 96], sizes = [8, 32], strides = [1, 1]} : vector<8x128xf32> to vector<8x32xf32>
    %130 = vector.extract_strided_slice %119 {offsets = [0, 64], sizes = [8, 32], strides = [1, 1]} : vector<8x128xf32> to vector<8x32xf32>
    %131 = math.tanh %130 : vector<8x32xf32>
    %132 = arith.mulf %128, %103 : vector<8x32xf32>
    %133 = arith.mulf %127, %131 : vector<8x32xf32>
    %134 = arith.addf %132, %133 : vector<8x32xf32>
    %135 = math.tanh %134 : vector<8x32xf32>
    %136 = arith.mulf %129, %135 : vector<8x32xf32>
    %c0_59 = arith.constant 0 : index
    %137 = arith.index_cast %114 : i32 to index
    %c0_60 = arith.constant 0 : index
    %c0_61 = arith.constant 0 : index
    %138 = vector.load %arg6[%c0_59, %137, %c0_60, %c0_61] : memref<1x8x8x32xf32, #tpu.memory_space<vmem>>, vector<1x1x8x32xf32>
    %139 = vector.shape_cast %138 : vector<1x1x8x32xf32> to vector<8x32xf32>
    %140 = vector.shape_cast %136 : vector<8x32xf32> to vector<1x1x8x32xf32>
    tpu.vector_store %arg6[%c0_59, %137, %c0_60, %c0_61], %140 {strides = array<i32>} : memref<1x8x8x32xf32, #tpu.memory_space<vmem>>, vector<1x1x8x32xf32>,
    %c4_i32 = arith.constant 4 : i32
    %c1_i32_62 = arith.constant 1 : i32
    %141 = arith.subi %c1_i32_62, %arg0 : i32
    %142 = arith.muli %141, %c4_i32 : i32
    %c7_i32_63 = arith.constant 7 : i32
    %143 = arith.subi %c7_i32_63, %c4_i32 : i32
    %144 = arith.muli %arg0, %143 : i32
    %145 = arith.addi %142, %144 : i32
    %146 = arith.index_cast %145 : i32 to index
    %c0_64 = arith.constant 0 : index
    %c0_65 = arith.constant 0 : index
    %147 = vector.load %arg7[%146, %c0_64, %c0_65] : memref<8x8x128xf32, #tpu.memory_space<vmem>>, vector<1x8x128xf32>
    %148 = vector.shape_cast %147 : vector<1x8x128xf32> to vector<8x128xf32>
    %cst_66 = arith.constant dense<0.000000e+00> : vector<8x128xf32>
    %149 = tpu.matmul %136, %6, %cst_66 {dimension_numbers = #tpu.dot_dimension_numbers<[1], [0], [0], [1], [0, 0, 1, 1], [], []>} : vector<8x32xf32>, vector<32x128xf32>, vector<8x128xf32> -> vector<8x128xf32>
    %150 = arith.addf %148, %149 : vector<8x128xf32>
    %cst_67 = arith.constant 5.000000e-01 : f32
    %151 = vector.broadcast %cst_67 : f32 to vector<8x128xf32>
    %152 = arith.mulf %151, %150 : vector<8x128xf32>
    %153 = math.tanh %152 : vector<8x128xf32>
    %cst_68 = arith.constant 5.000000e-01 : f32
    %154 = vector.broadcast %cst_68 : f32 to vector<8x128xf32>
    %155 = arith.mulf %154, %153 : vector<8x128xf32>
    %cst_69 = arith.constant 5.000000e-01 : f32
    %156 = vector.broadcast %cst_69 : f32 to vector<8x128xf32>
    %157 = arith.addf %155, %156 : vector<8x128xf32>
    %158 = vector.extract_strided_slice %157 {offsets = [0, 0], sizes = [8, 32], strides = [1, 1]} : vector<8x128xf32> to vector<8x32xf32>
    %159 = vector.extract_strided_slice %157 {offsets = [0, 32], sizes = [8, 32], strides = [1, 1]} : vector<8x128xf32> to vector<8x32xf32>
    %160 = vector.extract_strided_slice %157 {offsets = [0, 96], sizes = [8, 32], strides = [1, 1]} : vector<8x128xf32> to vector<8x32xf32>
    %161 = vector.extract_strided_slice %150 {offsets = [0, 64], sizes = [8, 32], strides = [1, 1]} : vector<8x128xf32> to vector<8x32xf32>
    %162 = math.tanh %161 : vector<8x32xf32>
    %163 = arith.mulf %159, %134 : vector<8x32xf32>
    %164 = arith.mulf %158, %162 : vector<8x32xf32>
    %165 = arith.addf %163, %164 : vector<8x32xf32>
    %166 = math.tanh %165 : vector<8x32xf32>
    %167 = arith.mulf %160, %166 : vector<8x32xf32>
    %c0_70 = arith.constant 0 : index
    %168 = arith.index_cast %145 : i32 to index
    %c0_71 = arith.constant 0 : index
    %c0_72 = arith.constant 0 : index
    %169 = vector.load %arg6[%c0_70, %168, %c0_71, %c0_72] : memref<1x8x8x32xf32, #tpu.memory_space<vmem>>, vector<1x1x8x32xf32>
    %170 = vector.shape_cast %169 : vector<1x1x8x32xf32> to vector<8x32xf32>
    %171 = vector.shape_cast %167 : vector<8x32xf32> to vector<1x1x8x32xf32>
    tpu.vector_store %arg6[%c0_70, %168, %c0_71, %c0_72], %171 {strides = array<i32>} : memref<1x8x8x32xf32, #tpu.memory_space<vmem>>, vector<1x1x8x32xf32>,
    %c5_i32 = arith.constant 5 : i32
    %c1_i32_73 = arith.constant 1 : i32
    %172 = arith.subi %c1_i32_73, %arg0 : i32
    %173 = arith.muli %172, %c5_i32 : i32
    %c7_i32_74 = arith.constant 7 : i32
    %174 = arith.subi %c7_i32_74, %c5_i32 : i32
    %175 = arith.muli %arg0, %174 : i32
    %176 = arith.addi %173, %175 : i32
    %177 = arith.index_cast %176 : i32 to index
    %c0_75 = arith.constant 0 : index
    %c0_76 = arith.constant 0 : index
    %178 = vector.load %arg7[%177, %c0_75, %c0_76] : memref<8x8x128xf32, #tpu.memory_space<vmem>>, vector<1x8x128xf32>
    %179 = vector.shape_cast %178 : vector<1x8x128xf32> to vector<8x128xf32>
    %cst_77 = arith.constant dense<0.000000e+00> : vector<8x128xf32>
    %180 = tpu.matmul %167, %6, %cst_77 {dimension_numbers = #tpu.dot_dimension_numbers<[1], [0], [0], [1], [0, 0, 1, 1], [], []>} : vector<8x32xf32>, vector<32x128xf32>, vector<8x128xf32> -> vector<8x128xf32>
    %181 = arith.addf %179, %180 : vector<8x128xf32>
    %cst_78 = arith.constant 5.000000e-01 : f32
    %182 = vector.broadcast %cst_78 : f32 to vector<8x128xf32>
    %183 = arith.mulf %182, %181 : vector<8x128xf32>
    %184 = math.tanh %183 : vector<8x128xf32>
    %cst_79 = arith.constant 5.000000e-01 : f32
    %185 = vector.broadcast %cst_79 : f32 to vector<8x128xf32>
    %186 = arith.mulf %185, %184 : vector<8x128xf32>
    %cst_80 = arith.constant 5.000000e-01 : f32
    %187 = vector.broadcast %cst_80 : f32 to vector<8x128xf32>
    %188 = arith.addf %186, %187 : vector<8x128xf32>
    %189 = vector.extract_strided_slice %188 {offsets = [0, 0], sizes = [8, 32], strides = [1, 1]} : vector<8x128xf32> to vector<8x32xf32>
    %190 = vector.extract_strided_slice %188 {offsets = [0, 32], sizes = [8, 32], strides = [1, 1]} : vector<8x128xf32> to vector<8x32xf32>
    %191 = vector.extract_strided_slice %188 {offsets = [0, 96], sizes = [8, 32], strides = [1, 1]} : vector<8x128xf32> to vector<8x32xf32>
    %192 = vector.extract_strided_slice %181 {offsets = [0, 64], sizes = [8, 32], strides = [1, 1]} : vector<8x128xf32> to vector<8x32xf32>
    %193 = math.tanh %192 : vector<8x32xf32>
    %194 = arith.mulf %190, %165 : vector<8x32xf32>
    %195 = arith.mulf %189, %193 : vector<8x32xf32>
    %196 = arith.addf %194, %195 : vector<8x32xf32>
    %197 = math.tanh %196 : vector<8x32xf32>
    %198 = arith.mulf %191, %197 : vector<8x32xf32>
    %c0_81 = arith.constant 0 : index
    %199 = arith.index_cast %176 : i32 to index
    %c0_82 = arith.constant 0 : index
    %c0_83 = arith.constant 0 : index
    %200 = vector.load %arg6[%c0_81, %199, %c0_82, %c0_83] : memref<1x8x8x32xf32, #tpu.memory_space<vmem>>, vector<1x1x8x32xf32>
    %201 = vector.shape_cast %200 : vector<1x1x8x32xf32> to vector<8x32xf32>
    %202 = vector.shape_cast %198 : vector<8x32xf32> to vector<1x1x8x32xf32>
    tpu.vector_store %arg6[%c0_81, %199, %c0_82, %c0_83], %202 {strides = array<i32>} : memref<1x8x8x32xf32, #tpu.memory_space<vmem>>, vector<1x1x8x32xf32>,
    %c6_i32 = arith.constant 6 : i32
    %c1_i32_84 = arith.constant 1 : i32
    %203 = arith.subi %c1_i32_84, %arg0 : i32
    %204 = arith.muli %203, %c6_i32 : i32
    %c7_i32_85 = arith.constant 7 : i32
    %205 = arith.subi %c7_i32_85, %c6_i32 : i32
    %206 = arith.muli %arg0, %205 : i32
    %207 = arith.addi %204, %206 : i32
    %208 = arith.index_cast %207 : i32 to index
    %c0_86 = arith.constant 0 : index
    %c0_87 = arith.constant 0 : index
    %209 = vector.load %arg7[%208, %c0_86, %c0_87] : memref<8x8x128xf32, #tpu.memory_space<vmem>>, vector<1x8x128xf32>
    %210 = vector.shape_cast %209 : vector<1x8x128xf32> to vector<8x128xf32>
    %cst_88 = arith.constant dense<0.000000e+00> : vector<8x128xf32>
    %211 = tpu.matmul %198, %6, %cst_88 {dimension_numbers = #tpu.dot_dimension_numbers<[1], [0], [0], [1], [0, 0, 1, 1], [], []>} : vector<8x32xf32>, vector<32x128xf32>, vector<8x128xf32> -> vector<8x128xf32>
    %212 = arith.addf %210, %211 : vector<8x128xf32>
    %cst_89 = arith.constant 5.000000e-01 : f32
    %213 = vector.broadcast %cst_89 : f32 to vector<8x128xf32>
    %214 = arith.mulf %213, %212 : vector<8x128xf32>
    %215 = math.tanh %214 : vector<8x128xf32>
    %cst_90 = arith.constant 5.000000e-01 : f32
    %216 = vector.broadcast %cst_90 : f32 to vector<8x128xf32>
    %217 = arith.mulf %216, %215 : vector<8x128xf32>
    %cst_91 = arith.constant 5.000000e-01 : f32
    %218 = vector.broadcast %cst_91 : f32 to vector<8x128xf32>
    %219 = arith.addf %217, %218 : vector<8x128xf32>
    %220 = vector.extract_strided_slice %219 {offsets = [0, 0], sizes = [8, 32], strides = [1, 1]} : vector<8x128xf32> to vector<8x32xf32>
    %221 = vector.extract_strided_slice %219 {offsets = [0, 32], sizes = [8, 32], strides = [1, 1]} : vector<8x128xf32> to vector<8x32xf32>
    %222 = vector.extract_strided_slice %219 {offsets = [0, 96], sizes = [8, 32], strides = [1, 1]} : vector<8x128xf32> to vector<8x32xf32>
    %223 = vector.extract_strided_slice %212 {offsets = [0, 64], sizes = [8, 32], strides = [1, 1]} : vector<8x128xf32> to vector<8x32xf32>
    %224 = math.tanh %223 : vector<8x32xf32>
    %225 = arith.mulf %221, %196 : vector<8x32xf32>
    %226 = arith.mulf %220, %224 : vector<8x32xf32>
    %227 = arith.addf %225, %226 : vector<8x32xf32>
    %228 = math.tanh %227 : vector<8x32xf32>
    %229 = arith.mulf %222, %228 : vector<8x32xf32>
    %c0_92 = arith.constant 0 : index
    %230 = arith.index_cast %207 : i32 to index
    %c0_93 = arith.constant 0 : index
    %c0_94 = arith.constant 0 : index
    %231 = vector.load %arg6[%c0_92, %230, %c0_93, %c0_94] : memref<1x8x8x32xf32, #tpu.memory_space<vmem>>, vector<1x1x8x32xf32>
    %232 = vector.shape_cast %231 : vector<1x1x8x32xf32> to vector<8x32xf32>
    %233 = vector.shape_cast %229 : vector<8x32xf32> to vector<1x1x8x32xf32>
    tpu.vector_store %arg6[%c0_92, %230, %c0_93, %c0_94], %233 {strides = array<i32>} : memref<1x8x8x32xf32, #tpu.memory_space<vmem>>, vector<1x1x8x32xf32>,
    %c7_i32_95 = arith.constant 7 : i32
    %c1_i32_96 = arith.constant 1 : i32
    %234 = arith.subi %c1_i32_96, %arg0 : i32
    %235 = arith.muli %234, %c7_i32_95 : i32
    %c7_i32_97 = arith.constant 7 : i32
    %236 = arith.subi %c7_i32_97, %c7_i32_95 : i32
    %237 = arith.muli %arg0, %236 : i32
    %238 = arith.addi %235, %237 : i32
    %239 = arith.index_cast %238 : i32 to index
    %c0_98 = arith.constant 0 : index
    %c0_99 = arith.constant 0 : index
    %240 = vector.load %arg7[%239, %c0_98, %c0_99] : memref<8x8x128xf32, #tpu.memory_space<vmem>>, vector<1x8x128xf32>
    %241 = vector.shape_cast %240 : vector<1x8x128xf32> to vector<8x128xf32>
    %cst_100 = arith.constant dense<0.000000e+00> : vector<8x128xf32>
    %242 = tpu.matmul %229, %6, %cst_100 {dimension_numbers = #tpu.dot_dimension_numbers<[1], [0], [0], [1], [0, 0, 1, 1], [], []>} : vector<8x32xf32>, vector<32x128xf32>, vector<8x128xf32> -> vector<8x128xf32>
    %243 = arith.addf %241, %242 : vector<8x128xf32>
    %cst_101 = arith.constant 5.000000e-01 : f32
    %244 = vector.broadcast %cst_101 : f32 to vector<8x128xf32>
    %245 = arith.mulf %244, %243 : vector<8x128xf32>
    %246 = math.tanh %245 : vector<8x128xf32>
    %cst_102 = arith.constant 5.000000e-01 : f32
    %247 = vector.broadcast %cst_102 : f32 to vector<8x128xf32>
    %248 = arith.mulf %247, %246 : vector<8x128xf32>
    %cst_103 = arith.constant 5.000000e-01 : f32
    %249 = vector.broadcast %cst_103 : f32 to vector<8x128xf32>
    %250 = arith.addf %248, %249 : vector<8x128xf32>
    %251 = vector.extract_strided_slice %250 {offsets = [0, 0], sizes = [8, 32], strides = [1, 1]} : vector<8x128xf32> to vector<8x32xf32>
    %252 = vector.extract_strided_slice %250 {offsets = [0, 32], sizes = [8, 32], strides = [1, 1]} : vector<8x128xf32> to vector<8x32xf32>
    %253 = vector.extract_strided_slice %250 {offsets = [0, 96], sizes = [8, 32], strides = [1, 1]} : vector<8x128xf32> to vector<8x32xf32>
    %254 = vector.extract_strided_slice %243 {offsets = [0, 64], sizes = [8, 32], strides = [1, 1]} : vector<8x128xf32> to vector<8x32xf32>
    %255 = math.tanh %254 : vector<8x32xf32>
    %256 = arith.mulf %252, %227 : vector<8x32xf32>
    %257 = arith.mulf %251, %255 : vector<8x32xf32>
    %258 = arith.addf %256, %257 : vector<8x32xf32>
    %259 = math.tanh %258 : vector<8x32xf32>
    %260 = arith.mulf %253, %259 : vector<8x32xf32>
    %c0_104 = arith.constant 0 : index
    %261 = arith.index_cast %238 : i32 to index
    %c0_105 = arith.constant 0 : index
    %c0_106 = arith.constant 0 : index
    %262 = vector.load %arg6[%c0_104, %261, %c0_105, %c0_106] : memref<1x8x8x32xf32, #tpu.memory_space<vmem>>, vector<1x1x8x32xf32>
    %263 = vector.shape_cast %262 : vector<1x1x8x32xf32> to vector<8x32xf32>
    %264 = vector.shape_cast %260 : vector<8x32xf32> to vector<1x1x8x32xf32>
    tpu.vector_store %arg6[%c0_104, %261, %c0_105, %c0_106], %264 {strides = array<i32>} : memref<1x8x8x32xf32, #tpu.memory_space<vmem>>, vector<1x1x8x32xf32>,
    %c8_i32 = arith.constant 8 : i32
    %c0_107 = arith.constant 0 : index
    %c0_108 = arith.constant 0 : index
    %265 = vector.load %arg8[%c0_107, %c0_108] : memref<8x32xf32, #tpu.memory_space<vmem>>, vector<8x32xf32>
    tpu.vector_store %arg8[%c0_107, %c0_108], %260 {strides = array<i32>} : memref<8x32xf32, #tpu.memory_space<vmem>>, vector<8x32xf32>,
    %c0_109 = arith.constant 0 : index
    %c0_110 = arith.constant 0 : index
    %266 = vector.load %arg9[%c0_109, %c0_110] : memref<8x32xf32, #tpu.memory_space<vmem>>, vector<8x32xf32>
    tpu.vector_store %arg9[%c0_109, %c0_110], %258 {strides = array<i32>} : memref<8x32xf32, #tpu.memory_space<vmem>>, vector<8x32xf32>,
    return
  }
  func.func @transform_0(%arg0: i32, %arg1: i32) -> (i32, i32) {
    %c1_i32 = arith.constant 1 : i32
    %0 = arith.subi %c1_i32, %arg0 : i32
    %1 = arith.muli %0, %arg1 : i32
    %c0_i32 = arith.constant 0 : i32
    %2 = arith.subi %c0_i32, %arg1 : i32
    %3 = arith.muli %arg0, %2 : i32
    %4 = arith.addi %1, %3 : i32
    %c0_i32_0 = arith.constant 0 : i32
    %c0_i32_1 = arith.constant 0 : i32
    return %4, %c0_i32_0 : i32, i32
  }
  func.func @transform_1(%arg0: i32, %arg1: i32) -> (i32, i32, i32) {
    %c0_i32 = arith.constant 0 : i32
    %c0_i32_0 = arith.constant 0 : i32
    %c0_i32_1 = arith.constant 0 : i32
    return %arg0, %c0_i32, %c0_i32_0 : i32, i32, i32
  }
  func.func @transform_2(%arg0: i32, %arg1: i32) -> (i32, i32, i32) {
    %c0_i32 = arith.constant 0 : i32
    %c0_i32_0 = arith.constant 0 : i32
    %c0_i32_1 = arith.constant 0 : i32
    return %arg0, %c0_i32, %c0_i32_0 : i32, i32, i32
  }
  func.func @transform_3(%arg0: i32, %arg1: i32) -> (i32, i32, i32) {
    %c0_i32 = arith.constant 0 : i32
    %c0_i32_0 = arith.constant 0 : i32
    %c0_i32_1 = arith.constant 0 : i32
    return %arg0, %c0_i32, %c0_i32_0 : i32, i32, i32
  }
  func.func @transform_4(%arg0: i32, %arg1: i32) -> (i32, i32, i32, i32) {
    %c1_i32 = arith.constant 1 : i32
    %0 = arith.subi %c1_i32, %arg0 : i32
    %1 = arith.muli %0, %arg1 : i32
    %c0_i32 = arith.constant 0 : i32
    %2 = arith.subi %c0_i32, %arg1 : i32
    %3 = arith.muli %arg0, %2 : i32
    %4 = arith.addi %1, %3 : i32
    %c0_i32_0 = arith.constant 0 : i32
    %c0_i32_1 = arith.constant 0 : i32
    %c0_i32_2 = arith.constant 0 : i32
    return %arg0, %4, %c0_i32_0, %c0_i32_1 : i32, i32, i32, i32
  }
}

</mosaic_0001>

<bundles_post_ra>
// kernel: tpu_custom_call.1
= control target key start
LH: loop header
LB: loop body
LE: loop exit
PB: predicated region body
PF: predicated region fallthrough
CT: control target
= control target key end

     0   :  { %6 = vsyncpa [#allocation3], 0  ;;  %s498_s0 = inlined_call_operand.hbm [shape: f32[16,128], index: 0, kind: input, shape index: {}]   ;;  %s499_s1 = inlined_call_operand.hbm [shape: f32[16,128], index: 1, kind: output, shape index: {}]  }
   0x1   :  { %7 = vsyncpa [#allocation4], 0 }
   0x2   :  { %9 = vsyncpa [#allocation4 + $0x1], 0  ;;  %s357_s6 = smov 0   ;;  %s359_s7 = smov 0  }
   0x3   :  { %s361_s8 = smov 0   ;;  %s363_s9 = smov 0  }
   0x4 LB: > { %s378_s10 = sadd.s32 4294967295, %s343_s9   ;;  %s192_s11 = sadd.s32 4294967294, %s343_s9   ;;  %s343_s9 = sphi %s363_s9, %s516_s9   ;;  %s339_s8 = sphi %s361_s8, %s515_s8   ;;  %s335_s7 = sphi %s359_s7, %s514_s7   ;;  %s331_s6 = sphi %s357_s6, %s513_s6  }
   0x5   : > { %s382_s12 = sadd.s32 1, %s343_s9   ;;  %s22_s13 = sadd.s32 1, %s339_s8 }
   0x6   : > { %s19_s14 = ssub.s32 %s343_s9, %s382_s12  ;;  %p35_p0 = scmp.ne.s32.totalorder %s335_s7, %s331_s6 }
   0x7   : > { %p20_p1 = scmp.eq.s32.totalorder %s19_s14, 0  ;;  %p36_p2 = scmp.eq.s32.totalorder %s378_s10, 0 }
   0x8   : > { %p58_p3 = scmp.ne.s32.totalorder %s339_s8, %s335_s7  ;;  %p59_p4 = scmp.eq.s32.totalorder %s378_s10, 1 }
   0x9   : > { %s394_s15 = scalar_select %p20_p1, %s339_s8, %s22_s13  }
   0xa   : > { %p396_p5 = por %p59_p4, %p58_p3  ;;  %p65_p6 = scmp.eq.s32.totalorder %s192_s11, 1 }
   0xb   : > { %p193_p7 = scmp.ge.s32.totalorder %s343_s9, 1  ;;  %p401_p8 = por %p36_p2, %p35_p0 }
   0xc   : > { %s504_s16 = scalar_select %p396_p5, 1, 0 }
   0xd   : > { %s505_s17 = scalar_select %p401_p8, 1, 0 }
   0xe   : > { %p72_p9 = scmp.lt.s32.totalorder %s343_s9, 3  ;;  %p406_p10 = por %p65_p6, %p35_p0 }
   0xf   : > { %s194_s19 = sshll.u32 %s378_s10, 7  ;;  %s345_s21 = smov [#allocation2]  }
  0x10   : > { %s506_s18 = scalar_select %p406_p10, 1, 0 }
  0x11   : > { %p411_p11 = pnand %p193_p7, %p72_p9  ;;  %s87_s22 = sshll.u32 %s345_s21, 4  ;;  %s88_s22 = int_to_ptr.vmem [resolvable:$true] %s87_s22 }
  0x12   : > { %s85_s25 = scalar_lea.hbm %s498_s0, %s194_s19  ;;  %s252_s30 = scalar_lea.hbm %s498_s0, 256 }
  0x13   : > { %s507_s20 = scalar_select %p411_p11, 1, 0 }
  0x14   : > { %p205_p12 = pneg %p411_p11  ;;  %s247_s27 = scalar_lea.hbm %s85_s25, 128 }
  0x15   : > { %p248_p0 = scmp.ne.s32.totalorder %s85_s25, %s247_s27  ;;  %p253_p4 = scmp.lt.u32.totalorder %s85_s25, %s498_s0 }
  0x16   : > { %p424_p13 = pnand %p205_p12, %p401_p8  ;;  %p254_p6 = scmp.lt.u32.totalorder %s252_s30, %s247_s27 }
  0x17   : > { %p256_p9 = scmp.lt.u32.totalorder %s247_s27, %s85_s25 }
  0x18   : > { %p249_p1 = pneg %p424_p13  ;;  %p255_p7 = por %p254_p6, %p253_p4 }
  0x1a   : > { %p250_p2 = pnand %p249_p1, %p248_p0  ;;  %p257_p12 = por %p256_p9, %p255_p7 }
  0x1c   : > { %p251_p3 = pneg %p250_p2 }
  0x1e   : > { %p258_p10 = pnand %p257_p12, %p251_p3 }
  0x20   : > { %261 = shalt.err (!%p258_p10)
}
  0x21   : > { %s262_s4 = scalar_lea.vmem %s88_s22, 128  ;;  %p270_p8 = scmp.lt.s32.totalorder %s88_s22, %s88_s22 }
  0x22   : > { %p263_p5 = scmp.ne.s32.totalorder %s88_s22, %s262_s4  ;;  %p271_p11 = scmp.lt.s32.totalorder %s262_s4, %s262_s4 }
  0x24   : > { %p265_p0 = pnand %p263_p5, %p249_p1  ;;  %p272_p4 = por %p271_p11, %p270_p8 }
  0x26   : > { %p266_p2 = pneg %p265_p0 }
  0x28   : > { %p273_p6 = pnand %p272_p4, %p266_p2 }
  0x2a   : > { %276 = shalt.err (!%p273_p6)
}
  0x2b   : > { %208 = dma.hbm_to_vmem [thread:$0]  (!%p424_p13), %s85_s25, 128, %s88_s22, [#allocation3]  }
  0x2c   : > { %p509_p7 = scmp.ne.s32.totalorder %s507_s20, 0 }
  0x2d   : > { %p510_p10 = scmp.ne.s32.totalorder (!%p509_p7), %s505_s17, 0 }
  0x2e   : > { %100 = sbr.rel (%p509_p7) target bundleno = 80 (0x50), region = 24 }
  0x35   : > { %322 = dma.done.wait (%p510_p10), [#allocation3], 128  }
  0x36   : > { %324 = vsyncadd (%p510_p10), [#allocation3], 4294967168  ;;  %s112_s5 = sand.u32 1, %s335_s7   ;;  %s456_s22 = scalar_lea.hbm %s499_s1, %s194_s19  ;;  %v115_v0 = vld [vmem:[#allocation2] sm:$0xff] }
  0x37   : > { %s196_s11 = sshll.u32 %s112_s5, 3  ;;  %s118_s17 = scalar_lea.sflag [#allocation4], %s112_s5 }
  0x38   : > { %s114_s13 = scalar_lea.vmem [#allocation5], %s196_s11  ;;  %p511_p8 = scmp.ne.s32.totalorder %s504_s16, 0 }
  0x39   : > { %s131_s14 = sshll.u32 %s114_s13, 4  ;;  %116 = vst [vmem:[%s114_s13] sm:$0xff] %v115_v0  ;;  %s346_s24 = smov [#allocation5]   ;;  %s458_s14 = int_to_ptr.vmem [resolvable:$true] %s131_s14 }
  0x3a   : > { %s277_s20 = scalar_lea.vmem %s458_s14, 128  ;;  %s281_s10 = sshll.u32 %s346_s24, 4  ;;  %s282_s10 = int_to_ptr.vmem [resolvable:$false] %s281_s10 }
  0x3b   : > { %p278_p5 = scmp.ne.s32.totalorder %s458_s14, %s277_s20  ;;  %s283_s25 = scalar_lea.vmem %s282_s10, 256 }
  0x3c   : > { %p284_p1 = scmp.lt.s32.totalorder %s458_s14, %s282_s10  ;;  %p285_p3 = scmp.lt.s32.totalorder %s283_s25, %s277_s20 }
  0x3d   : > { %p279_p11 = pnand %p278_p5, %p511_p8 }
  0x3e   : > { %p286_p9 = por %p285_p3, %p284_p1 }
  0x3f   : > { %p280_p13 = pneg %p279_p11 }
  0x41   : > { %p287_p12 = pnand %p286_p9, %p280_p13 }
  0x43   : > { %290 = shalt.err (!%p287_p12)
}
  0x44   : > { %s291_s19 = scalar_lea.hbm %s456_s22, 128  ;;  %s295_s28 = scalar_lea.hbm %s499_s1, 256 }
  0x45   : > { %p292_p0 = scmp.ne.s32.totalorder %s456_s22, %s291_s19  ;;  %p296_p6 = scmp.lt.u32.totalorder %s456_s22, %s499_s1 }
  0x46   : > { %p297_p7 = scmp.lt.u32.totalorder %s295_s28, %s291_s19  ;;  %p299_p5 = scmp.lt.u32.totalorder %s291_s19, %s456_s22 }
  0x47   : > { %p293_p2 = pnand %p292_p0, %p511_p8 }
  0x48   : > { %p298_p10 = por %p297_p7, %p296_p6 }
  0x49   : > { %p294_p4 = pneg %p293_p2 }
  0x4a   : > { %p300_p11 = por %p299_p5, %p298_p10 }
  0x4c   : > { %p301_p13 = pnand %p300_p11, %p294_p4 }
  0x4e   : > { %304 = shalt.err (!%p301_p13)
}
  0x4f   : > { %203 = dma.vmem_to_hbm [thread:$0]  (%p511_p8), %s458_s14, 128, %s456_s22, %s118_s17  }
  0x50 PF: > { %p213_p1 = scmp.ge.s32.totalorder %s343_s9, 2  ;;  %s143_s2 = sand.u32 1, %s331_s6  }
  0x51   : > { %p512_p3 = scmp.ne.s32.totalorder %s506_s18, 0  ;;  %s144_s3 = scalar_lea.sflag [#allocation4], %s143_s2 }
  0x53   : > { %p210_p9 = pnand %p213_p1, %p512_p3 }
  0x55   : > { %326 = dma.done.wait (!%p210_p9), %s144_s3, 128  }
  0x56   : > { %328 = vsyncadd (!%p210_p9), %s144_s3, 4294967168  ;;  %p12_p12 = scmp.ge.s32.totalorder %s382_s12, 4   ;;  %s513_s6 = smov %s335_s7 }
  0x57   : > { %s514_s7 = smov %s339_s8  ;;  %s515_s8 = smov %s394_s15 }
  0x58   : > { %s516_s9 = smov %s382_s12  ;;  %14 = sbr.rel (!%p12_p12) target bundleno = 4 (0x4), region = 62 }
  0x5f   :  { %149 = vsyncpa [#allocation3], 1 }
  0x60   :  { %151 = vsyncpa [#allocation3 + $0x1], 1 }
  0x61   :  { %152 = vsyncpa [#allocation4], 1 }
  0x62   :  { %154 = vsyncpa [#allocation4 + $0x1], 1 }

// kernel: tpu_custom_call.1
= control target key start
LH: loop header
LB: loop body
LE: loop exit
PB: predicated region body
PF: predicated region fallthrough
CT: control target
= control target key end

     0   :  { %9 = vsyncpa [#allocation6], 0  ;;  %s2461_s0 = inlined_call_operand.vmem [shape: f32[64,16], index: 0, kind: input, shape index: {}]   ;;  %s2462_s1 = inlined_call_operand.hbm [shape: f32[2,16,128], index: 1, kind: input, shape index: {}]   ;;  %s2463_s2 = inlined_call_operand.vmem [shape: f32[2,32,128], index: 2, kind: input, shape index: {}]   ;;  %s2464_s3 = inlined_call_operand.vmem [shape: f32[2,1,128], index: 3, kind: input, shape index: {}]   ;;  %s2465_s4 = inlined_call_operand.hbm [shape: f32[2,8,8,32], index: 4, kind: output, shape index: {}]  }
   0x1   :  { %11 = vsyncpa [#allocation6 + $0x1], 0 }
   0x2   :  { %12 = vsyncpa [#allocation7], 0 }
   0x3   :  { %14 = vsyncpa [#allocation7 + $0x1], 0  ;;  %s2098_s15 = smov 0   ;;  %s2100_s16 = smov 0  }
   0x4   :  { %s2102_s17 = smov 0   ;;  %s2104_s18 = smov 0  }
   0x5   :  { %s2106_s19 = smov 0   ;;  %s2108_s20 = smov 0  }
   0x6 LB: > { %s1571_s21 = sadd.s32 4294967295, %s2059_s20   ;;  %s1572_s22 = sadd.s32 4294967294, %s2059_s20   ;;  %s2059_s20 = sphi %s2108_s20, %s20_s20   ;;  %s2055_s19 = sphi %s2106_s19, %s2480_s19   ;;  %s2051_s18 = sphi %s2104_s18, %s2479_s18   ;;  %s2047_s17 = sphi %s2102_s17, %s2478_s17   ;;  %s2043_s16 = sphi %s2100_s16, %s2477_s16   ;;  %s2039_s15 = sphi %s2098_s15, %s2476_s15  }
   0x7   : > { %s32_s23 = sadd.s32 1, %s2055_s19  ;;  %s75_s24 = sadd.s32 1, %s2047_s17 }
   0x8   : > { %p34_p0 = scmp.ge.s32.totalorder %s32_s23, 2  ;;  %p82_p1 = scmp.ne.s32.totalorder %s2047_s17, %s2043_s16 }
   0x9   : > { %p83_p2 = scmp.eq.s32.totalorder %s2059_s20, 0  ;;  %p88_p3 = scmp.ne.s32.totalorder %s2043_s16, %s2039_s15 }
   0xa   : > { %s2482_s23 = smov (%p34_p0, %s32_s23), 0  ;;  %p89_p5 = scmp.eq.s32.totalorder %s1571_s21, 0 }
   0xb   : > { %p2139_p4 = por %p83_p2, %p82_p1  ;;  %s72_s26 = ssub.s32 %s2055_s19, %s2482_s23 }
   0xc   : > { %p176_p6 = scmp.eq.s32.totalorder %s1571_s21, 1  ;;  %p73_p7 = scmp.eq.s32.totalorder %s72_s26, 0 }
   0xd   : > { %p2145_p8 = por %p89_p5, %p88_p3  ;;  %p182_p10 = scmp.eq.s32.totalorder %s1572_s22, 1 }
   0xe   : > { %p2149_p9 = por %p176_p6, %p82_p1  ;;  %p1839_p13 = scmp.lt.s32.totalorder %s2059_s20, 2 }
   0xf   : > { %s2154_s29 = scalar_select %p73_p7, %s2047_s17, %s75_s24  }
  0x10   : > { %s2469_s28 = scalar_select %p2149_p9, 1, 0 }
  0x11   : > { %p2156_p11 = por %p182_p10, %p88_p3  ;;  %s221_s5 = sand.u32 1, %s2047_s17  }
  0x12   : > { %s1576_s6 = sshll.u32 %s221_s5, 4  ;;  %s1618_s7 = sshll.u32 %s2055_s19, 8 }
  0x13   : > { %s2470_s30 = scalar_select %p2156_p11, 1, 0 }
  0x14   : > { %s2167_s10 = scalar_lea.hbm %s2462_s1, %s1618_s7  ;;  %s225_s11 = scalar_lea.vmem [#allocation5], %s1576_s6 }
  0x15   : > { %s232_s12 = sshll.u32 %s225_s11, 4  ;;  %p2173_p0 = pnand %p1839_p13, %p2139_p4  ;;  %s2169_s12 = int_to_ptr.vmem [resolvable:$true] %s232_s12 }
  0x16   : > { %s2178_s14 = scalar_lea.sflag [#allocation6], %s221_s5  ;;  %s1947_s21 = scalar_lea.hbm %s2167_s10, 256 }
  0x17   : > { %p1948_p2 = scmp.ne.s32.totalorder %s2167_s10, %s1947_s21  ;;  %p1949_p3 = pneg %p2173_p0 }
  0x18   : > { %s1952_s25 = scalar_lea.hbm %s2462_s1, 512  ;;  %p1953_p4 = scmp.lt.u32.totalorder %s2167_s10, %s2462_s1 }
  0x19   : > { %p1950_p5 = pnand %p1949_p3, %p1948_p2  ;;  %p1954_p7 = scmp.lt.u32.totalorder %s1952_s25, %s1947_s21 }
  0x1a   : > { %p1956_p13 = scmp.lt.u32.totalorder %s1947_s21, %s2167_s10 }
  0x1b   : > { %p1951_p6 = pneg %p1950_p5  ;;  %p1955_p10 = por %p1954_p7, %p1953_p4 }
  0x1d   : > { %p1957_p12 = por %p1956_p13, %p1955_p10 }
  0x1f   : > { %p1958_p1 = pnand %p1957_p12, %p1951_p6 }
  0x21   : > { %1961 = shalt.err (!%p1958_p1)
}
  0x22   : > { %s1962_s5 = scalar_lea.vmem %s2169_s12, 256  ;;  %s2061_s7 = smov [#allocation5]  }
  0x23   : > { %p1963_p2 = scmp.ne.s32.totalorder %s2169_s12, %s1962_s5  ;;  %s1967_s8 = sshll.u32 %s2061_s7, 4  ;;  %s1968_s8 = int_to_ptr.vmem [resolvable:$false] %s1967_s8 }
  0x24   : > { %s1969_s9 = scalar_lea.vmem %s1968_s8, 512  ;;  %p1970_p9 = scmp.lt.s32.totalorder %s2169_s12, %s1968_s8 }
  0x25   : > { %p1965_p5 = pnand %p1963_p2, %p1949_p3  ;;  %p1971_p4 = scmp.lt.s32.totalorder %s1969_s9, %s1962_s5 }
  0x27   : > { %p1966_p11 = pneg %p1965_p5  ;;  %p1972_p7 = por %p1971_p4, %p1970_p9 }
  0x29   : > { %p1973_p10 = pnand %p1972_p7, %p1966_p11 }
  0x2b   : > { %1976 = shalt.err (!%p1973_p10)
}
  0x2c   : > { %s2062_s11 = smov 128   ;;  %s2063_s21 = smov 8  }
  0x2d   : > { %1834 = dma.hbm_to_vmem [thread:$0]  (!%p2173_p0), %s2167_s10, 256, %s2169_s12, %s2178_s14, %s2062_s11, %s2062_s11, %s2063_s21  }
  0x2e   : > { %p254_p12 = scmp.lt.s32.totalorder %s2059_s20, 3  ;;  %p2472_p1 = scmp.ge.s32.totalorder %s2059_s20, 1 }
  0x30   : > { %p255_p3 = pnand %p2472_p1, %p254_p12 }
  0x31   : > { %s2210_s22 = sand.u32 (!%p255_p3), 1, %s2043_s16  }
  0x32   : > { %258 = sbr.rel (%p255_p3) target bundleno = 5720 (0x1658), region = 36  ;;  %s1580_s24 = sshll.u32 (!%p255_p3), %s2210_s22, 4 }
  0x33   : > { %s261_s25 = scalar_lea.sflag (!%p255_p3), [#allocation6], %s2210_s22  ;;  %s264_s26 = scalar_lea.vmem (!%p255_p3), [#allocation5], %s1580_s24 }
  0x39   : > { %2030 = dma.done.wait (%p2145_p8), %s261_s25, 256  }
  0x3a   : > { %2032 = vsyncadd (%p2145_p8), %s261_s25, 4294967040  ;;  %p323_p9 = scmp.lt.s32.totalorder %s2051_s18, 1  ;;  %v2064_v0 = vmov 0.0|0.0   ;;  %vm2065_vm0 = vmmov 0   ;;  %v2066_v1 = vmov 0.0   ;;  %vm341_vm1 = vcmask 261120  }
  0x3b   : > { %1779 = vmatprep.subr.bf16.mxu1 %v2064_v0  ;;  %1695 = vmatprep.mubr.msk.f32.mxu1 %vm2065_vm0, %v2066_v1  ;;  %342 = vst.msk [vmem:[#allocation3] sm:$0xff] %vm341_vm1, %v2066_v1  ;;  %343 = vst.msk [vmem:[#allocation4] sm:$0xff] %vm341_vm1, %v2066_v1  ;;  %vm365_vm2 = vcmask 130048   ;;  %v344_v2 = vld [vmem:[%s264_s26] sm:$0xff]  ;;  %v345_v3 = vld [vmem:[%s264_s26 + $0x8] sm:$0xff]  ;;  %s2067_s21 = smov 64  }
  0x3c   : > { %s2223_s10 = scalar_select %p323_p9, %s2051_s18, 1  ;;  %v351_v4 = vld [vmem:[%s2461_s0] sm:$0xff]  ;;  %v1775_v5 = vpack.c.bf16 %v345_v3, %v344_v2  ;;  %v352_v8 = vld [vmem:[%s2461_s0 + $0x8] sm:$0xff]  ;;  %v353_v12 = vld [vmem:[%s2461_s0 + $0x10] sm:$0xff] }
  0x3d   : > { %1675 = vmatprep.mubr.msk.f32.mxu0 %vm365_vm2, %v351_v4  ;;  %v354_v14 = vld [vmem:[%s2461_s0 + $0x18] sm:$0xff]  ;;  %v355_v15 = vld [vmem:[%s2461_s0 + $0x20] sm:$0xff]  ;;  %v356_v17 = vld [vmem:[%s2461_s0 + $0x28] sm:$0xff]  ;;  %s2068_s24 = smov 32   ;;  %s1581_s25 = sshll.u32 %s2210_s22, 6 }
  0x3e   : > { %s1619_s27 = sshll.u32 %s2223_s10, 5  ;;  %1776 = vmatprep.subr.bf16.mxu0 %v1775_v5  ;;  %v357_v18 = vld [vmem:[%s2461_s0 + $0x30] sm:$0xff]  ;;  %v358_v19 = vld [vmem:[%s2461_s0 + $0x38] sm:$0xff]  ;;  %s330_s9 = scalar_lea.vmem %s2464_s3, %s2223_s10 }
  0x3f   : > { %s327_s5 = scalar_lea.vmem %s2463_s2, %s1619_s27  ;;  %1778 = vmatpush3.bf16.msra.mxu0 %v1775_v5  ;;  %v1584_v20 = vld [vmem:[%s330_s9] ss:$0 sm:$0xff]  ;;  %s1593_s10 = smul.u32 56, %s2051_s18 }
  0x40   : > { %v346_v6 = vld [vmem:[%s327_s5] sm:$0xff]  ;;  %v347_v7 = vld [vmem:[%s327_s5 + $0x8] sm:$0xff]  ;;  %v348_v10 = vld [vmem:[%s327_s5 + $0x10] sm:$0xff]  ;;  %1791 = vmatprep.subr.bf16.mxu0 %v2064_v0  ;;  %s2300_s26 = scalar_lea.vmem [#allocation8], %s1581_s25  ;;  %s617_s12 = smul.u32 6, %s2051_s18 }
  0x41   : > { %v2240_v9 = vpack.c.bf16 %v347_v7, %v346_v6  ;;  %v349_v11 = vld [vmem:[%s327_s5 + $0x18] sm:$0xff]  ;;  %s507_s11 = scalar_lea.vmem [#allocation2], %s1593_s10  ;;  %s614_s27 = scalar_lea.vmem %s2300_s26, %s1593_s10 [#allocation8] }
  0x42   : > { %v2247_v13 = vpack.c.bf16 %v349_v11, %v348_v10  ;;  %1676 = vmatmul.mubr.msk.f32.vlgmr.msra.gmra.mrb[0].mxu0 %vm365_vm2, %v352_v8  ;;  %v503_v16 = vld [vmem:[#allocation3] sm:$0xff]  ;;  %v504_v42 = vld [vmem:[#allocation4] sm:$0xff]  ;;  %s2315_s13 = ssub.s32 1, %s2051_s18  ;;  %s724_s8 = smul.u32 5, %s2051_s18 }
  0x43   : > { %1781 = vmatpush3.bf16.msra.mxu1 %v2240_v9  ;;  %1678 = vmatprep.mubr.msk.f32.mxu0 %vm365_vm2, %v353_v12  ;;  %s618_s14 = sadd.s32 %s617_s12, %s2315_s13  ;;  %s1597_s9 = sshll.u32 %s2315_s13, 1 }
  0x44   : > { %1782 = vmatprep.subr.bf16.mxu1 %v2064_v0  ;;  %1793 = vmatpush3.bf16.msra.mxu0 %v2240_v9  ;;  %s1595_s6 = sshll.u32 %s618_s14, 3  ;;  %s725_s10 = sadd.s32 %s1597_s9, %s724_s8 }
  0x45   : > { %1794 = vmatprep.subr.bf16.mxu0 %v2064_v0  ;;  %s620_s5 = scalar_lea.vmem [#allocation2], %s1595_s6  ;;  %s721_s7 = scalar_lea.vmem %s2300_s26, %s1595_s6 [#allocation8] }
  0x46   : > { %1679 = vmatmul.mubr.msk.f32.gmra.mrb[2].mxu0 %vm365_vm2, %v354_v14  ;;  %s830_s12 = smul.u32 3, %s2315_s13  ;;  %s1600_s14 = sshll.u32 %s2051_s18, 2 }
  0x47   : > { %1784 = vmatpush3.bf16.msra.mxu1 %v2247_v13  ;;  %1681 = vmatprep.mubr.msk.f32.mxu0 %vm365_vm2, %v355_v15  ;;  %s938_s9 = smul.u32 3, %s2051_s18  ;;  %p2473_p11 = scmp.ne.s32.totalorder %s2469_s28, 0 }
  0x48   : > { %1785 = vmatprep.subr.bf16.mxu1 %v2064_v0  ;;  %1796 = vmatpush3.bf16.msra.mxu0 %v2247_v13  ;;  %s832_s6 = sadd.s32 %s1600_s14, %s830_s12  ;;  %s1044_s14 = smul.u32 5, %s2315_s13 }
  0x49   : > { %1803 = vmatprep.subr.bf16.mxu0 %v2064_v0 }
  0x4a   : > { %1696 = vmatmul.mubr.msk.f32.vlgmr.msra.gmra.mrb[0].mxu1 %vm341_vm1, %v503_v16  ;;  %1682 = vmatmul.mubr.msk.f32.gmra.mrb[4].mxu0 %vm365_vm2, %v356_v17 }
  0x4b   : > { %1787 = vmatpush3.bf16.msra.mxu1 %v2240_v9  ;;  %1706 = vmatprep.mubr.msk.f32.mxu1 %vm2065_vm0, %v2066_v1 }
  0x4c   : > { %1788 = vmatprep.subr.bf16.mxu1 %v2064_v0  ;;  %1684 = vmatprep.mubr.msk.f32.mxu0 %vm365_vm2, %v357_v18 }
  0x4e   : > { %1685 = vmatmul.mubr.msk.f32.gmra.mrb[6].mxu0 %vm365_vm2, %v358_v19 }
  0x4f   : > { %1790 = vmatpush3.bf16.msra.mxu1 %v2247_v13  ;;  %1717 = vmatprep.mubr.msk.f32.mxu0 %vm2065_vm0, %v2066_v1 }
  0x50   : > { %1797 = vmatprep.subr.bf16.mxu1 %v2064_v0 }
 0x115   : > { %v1677_v21 = vpop.f32.mrb[0].mxu0 }
 0x116   : > { %v462_v22 = vadd.f32 %v1677_v21, %v1584_v20  ;;  %v456_v23 = vpop.f32.mrb[1].mxu0 }
 0x117   : > { %v457_v24 = vadd.f32 %v1584_v20, %v456_v23 }
 0x118   : > { %496 = vst [vmem:[#allocation2 + $0x8] sm:$0xff] %v462_v22 }
 0x119   : > { %495 = vst [vmem:[#allocation2] sm:$0xff] %v457_v24  ;;  %v1680_v25 = vpop.f32.mrb[2].mxu0 }
 0x11a   : > { %v472_v26 = vadd.f32 %v1680_v25, %v1584_v20  ;;  %v466_v27 = vpop.f32.mrb[3].mxu0 }
 0x11b   : > { %v467_v28 = vadd.f32 %v1584_v20, %v466_v27 }
 0x11c   : > { %498 = vst [vmem:[#allocation2 + $0x18] sm:$0xff] %v472_v26 }
 0x11d   : > { %v579_v29 = vpop.f32.mrb[0].mxu1  ;;  %497 = vst [vmem:[#allocation2 + $0x10] sm:$0xff] %v467_v28  ;;  %v1683_v31 = vpop.f32.mrb[4].mxu0 }
 0x11e   : > { %v1697_v30 = vpop.f32.mrb[1].mxu1  ;;  %v482_v32 = vadd.f32 %v1683_v31, %v1584_v20  ;;  %v476_v33 = vpop.f32.mrb[5].mxu0 }
 0x11f   : > { %v477_v34 = vadd.f32 %v1584_v20, %v476_v33 }
 0x120   : > { %500 = vst [vmem:[#allocation2 + $0x28] sm:$0xff] %v482_v32 }
 0x121   : > { %499 = vst [vmem:[#allocation2 + $0x20] sm:$0xff] %v477_v34  ;;  %v1686_v35 = vpop.f32.mrb[6].mxu0 }
 0x122   : > { %v492_v36 = vadd.f32 %v1686_v35, %v1584_v20  ;;  %v486_v37 = vpop.f32.mrb[7].mxu0 }
 0x123   : > { %v487_v38 = vadd.f32 %v1584_v20, %v486_v37 }
 0x124   : > { %502 = vst [vmem:[#allocation2 + $0x38] sm:$0xff] %v492_v36 }
 0x125   : > { %501 = vst [vmem:[#allocation2 + $0x30] sm:$0xff] %v487_v38 }
 0x12c   : > { %v508_v39 = vld [vmem:[%s507_s11] sm:$0xff]  ;;  %s1598_s11 = sshll.u32 %s725_s10, 3  ;;  %s1603_s10 = sshll.u32 %s2315_s13, 2 }
 0x12d   : > { %v583_v40 = vadd.f32 %v579_v29, %v508_v39  ;;  %v621_v57 = vld [vmem:[%s620_s5] sm:$0xff]  ;;  %s727_s25 = scalar_lea.vmem [#allocation2], %s1598_s11  ;;  %s1601_s5 = sshll.u32 %s832_s6, 3 }
 0x12e   : > { %v728_v15 = vld [vmem:[%s727_s25] sm:$0xff]  ;;  %s935_s8 = scalar_lea.vmem %s2300_s26, %s1601_s5 [#allocation8]  ;;  %s1606_s6 = sshll.u32 %s2051_s18, 1 }
 0x12f   : > { %1899 = vtanh.f32 %v583_v40  ;;  %v584_v43 = vmul.f32 0.5, %v583_v40 }
 0x131   : > { %1901 = vtanh.f32 %v584_v43 }
 0x139   : > { %v1900_v41 = vpop.eup %1899 }
 0x13a   : > { %595 = vrot.lane.b32.xlu0 %v1900_v41, %s2067_s21 }
 0x13b   : > { %v1902_v44 = vpop.eup %1901 }
 0x13c   : > { %v586_v45 = vmul.f32 0.5, %v1902_v44 }
 0x13e   : > { %590 = vrot.lane.b32.xlu0 %v504_v42, %s2068_s24  ;;  %v587_v46 = vadd.f32 0.5, %v586_v45 }
 0x1ac   : > { %v596_v47 = vpop.permute.xlu0 %595 }
 0x1ad   : > { %v598_v48 = vmul.f32 %v596_v47, %v587_v46 }
 0x1af   : > { %600 = vrot.lane.b32.xlu1 %v598_v48, %s2068_s24 }
 0x1b0   : > { %v591_v49 = vpop.permute.xlu0 %590 }
 0x1b1   : > { %v593_v50 = vmul.f32 %v591_v49, %v587_v46 }
 0x221   : > { %v601_v51 = vpop.permute.xlu1 %600 }
 0x222   : > { %v603_v52 = vadd.f32 %v601_v51, %v593_v50 }
 0x224   : > { %1903 = vtanh.f32 %v603_v52 }
 0x22e   : > { %v1904_v53 = vpop.eup %1903 }
 0x22f   : > { %606 = vrot.lane.b32.xlu1 %v1904_v53, %s2067_s21 }
 0x2a1   : > { %v607_v54 = vpop.permute.xlu1 %606 }
 0x2a2   : > { %v609_v55 = vmul.f32 %v607_v54, %v587_v46 }
 0x2a4   : > { %611 = vrot.lane.b32.xlu0 %v609_v55, %s2068_s24 }
 0x316   : > { %v612_v56 = vpop.permute.xlu0 %611 }
 0x317   : > { %615 = vst.msk [vmem:[%s614_s27] sm:$0xff] %vm341_vm1, %v612_v56  ;;  %1707 = vmatmul.mubr.msk.f32.vlgmr.msra.gmra.mrb[2].mxu1 %vm341_vm1, %v612_v56  ;;  %s828_s27 = scalar_lea.vmem %s2300_s26, %s1598_s11 [#allocation8]  ;;  %s939_s11 = sadd.s32 %s1603_s10, %s938_s9 }
 0x318   : > { %1799 = vmatpush3.bf16.msra.mxu1 %v2240_v9  ;;  %1728 = vmatprep.mubr.msk.f32.mxu1 %vm2065_vm0, %v2066_v1  ;;  %s1604_s25 = sshll.u32 %s939_s11, 3  ;;  %s1151_s10 = smul.u32 6, %s2315_s13 }
 0x319   : > { %1800 = vmatprep.subr.bf16.mxu1 %v2064_v0  ;;  %s1042_s12 = scalar_lea.vmem %s2300_s26, %s1604_s25 [#allocation8] }
 0x31a   : > { %s1152_s11 = sadd.s32 %s2051_s18, %s1151_s10 }
 0x31c   : > { %1802 = vmatpush3.bf16.msra.mxu1 %v2247_v13 }
 0x31d   : > { %1809 = vmatprep.subr.bf16.mxu1 %v2064_v0 }
 0x3ea   : > { %v690_v58 = vpop.f32.mrb[2].mxu1 }
 0x3eb   : > { %v694_v59 = vadd.f32 %v690_v58, %v621_v57  ;;  %v1708_v60 = vpop.f32.mrb[3].mxu1 }
 0x3ed   : > { %1905 = vtanh.f32 %v694_v59  ;;  %v695_v62 = vmul.f32 0.5, %v694_v59 }
 0x3ef   : > { %1907 = vtanh.f32 %v695_v62 }
 0x3f7   : > { %v1906_v61 = vpop.eup %1905 }
 0x3f8   : > { %702 = vrot.lane.b32.xlu1 %v1906_v61, %s2067_s21 }
 0x3f9   : > { %v1908_v63 = vpop.eup %1907 }
 0x3fa   : > { %v697_v2 = vmul.f32 0.5, %v1908_v63 }
 0x3fc   : > { %v698_v3 = vadd.f32 0.5, %v697_v2 }
 0x3fe   : > { %v700_v6 = vmul.f32 %v698_v3, %v603_v52 }
 0x46a   : > { %v703_v4 = vpop.permute.xlu1 %702 }
 0x46b   : > { %v705_v5 = vmul.f32 %v703_v4, %v698_v3 }
 0x46d   : > { %707 = vrot.lane.b32.xlu0 %v705_v5, %s2068_s24 }
 0x4df   : > { %v708_v7 = vpop.permute.xlu0 %707 }
 0x4e0   : > { %v710_v8 = vadd.f32 %v708_v7, %v700_v6 }
 0x4e2   : > { %1909 = vtanh.f32 %v710_v8 }
 0x4ec   : > { %v1910_v10 = vpop.eup %1909 }
 0x4ed   : > { %713 = vrot.lane.b32.xlu1 %v1910_v10, %s2067_s21 }
 0x55f   : > { %v714_v11 = vpop.permute.xlu1 %713 }
 0x560   : > { %v716_v12 = vmul.f32 %v714_v11, %v698_v3 }
 0x562   : > { %718 = vrot.lane.b32.xlu0 %v716_v12, %s2068_s24 }
 0x5d4   : > { %v719_v14 = vpop.permute.xlu0 %718 }
 0x5d5   : > { %722 = vst.msk [vmem:[%s721_s7] sm:$0xff] %vm341_vm1, %v719_v14  ;;  %1718 = vmatmul.mubr.msk.f32.vlgmr.msra.gmra.mrb[8].mxu0 %vm341_vm1, %v719_v14  ;;  %s834_s7 = scalar_lea.vmem [#allocation2], %s1601_s5  ;;  %s1046_s5 = sadd.s32 %s1606_s6, %s1044_s14 }
 0x5d6   : > { %1805 = vmatpush3.bf16.msra.mxu0 %v2240_v9  ;;  %1739 = vmatprep.mubr.msk.f32.mxu0 %vm2065_vm0, %v2066_v1  ;;  %v835_v33 = vld [vmem:[%s834_s7] sm:$0xff]  ;;  %s1607_s7 = sshll.u32 %s1046_s5, 3  ;;  %s1611_s14 = smul.u32 56, %s2315_s13 }
 0x5d7   : > { %1806 = vmatprep.subr.bf16.mxu0 %v2064_v0  ;;  %s1149_s9 = scalar_lea.vmem %s2300_s26, %s1607_s7 [#allocation8]  ;;  %s2069_s5 = smov 96  }
 0x5d8   : > { %s1259_s6 = scalar_lea.vmem [#allocation2], %s1611_s14 }
 0x5da   : > { %1808 = vmatpush3.bf16.msra.mxu0 %v2247_v13 }
 0x5db   : > { %1815 = vmatprep.subr.bf16.mxu0 %v2064_v0 }
 0x6a8   : > { %v797_v16 = vpop.f32.mrb[8].mxu0 }
 0x6a9   : > { %v801_v17 = vadd.f32 %v797_v16, %v728_v15  ;;  %v1719_v18 = vpop.f32.mrb[9].mxu0 }
 0x6ab   : > { %1911 = vtanh.f32 %v801_v17  ;;  %v802_v20 = vmul.f32 0.5, %v801_v17 }
 0x6ad   : > { %1913 = vtanh.f32 %v802_v20 }
 0x6b5   : > { %v1912_v19 = vpop.eup %1911 }
 0x6b6   : > { %809 = vrot.lane.b32.xlu1 %v1912_v19, %s2067_s21 }
 0x6b7   : > { %v1914_v21 = vpop.eup %1913 }
 0x6b8   : > { %v804_v22 = vmul.f32 0.5, %v1914_v21 }
 0x6ba   : > { %v805_v23 = vadd.f32 0.5, %v804_v22 }
 0x6bc   : > { %v807_v26 = vmul.f32 %v805_v23, %v710_v8 }
 0x728   : > { %v810_v24 = vpop.permute.xlu1 %809 }
 0x729   : > { %v812_v25 = vmul.f32 %v810_v24, %v805_v23 }
 0x72b   : > { %814 = vrot.lane.b32.xlu0 %v812_v25, %s2068_s24 }
 0x79d   : > { %v815_v27 = vpop.permute.xlu0 %814 }
 0x79e   : > { %v817_v28 = vadd.f32 %v815_v27, %v807_v26 }
 0x7a0   : > { %1915 = vtanh.f32 %v817_v28 }
 0x7aa   : > { %v1916_v29 = vpop.eup %1915 }
 0x7ab   : > { %820 = vrot.lane.b32.xlu1 %v1916_v29, %s2067_s21 }
 0x81d   : > { %v821_v30 = vpop.permute.xlu1 %820 }
 0x81e   : > { %v823_v31 = vmul.f32 %v821_v30, %v805_v23 }
 0x820   : > { %825 = vrot.lane.b32.xlu0 %v823_v31, %s2068_s24 }
 0x892   : > { %v826_v32 = vpop.permute.xlu0 %825 }
 0x893   : > { %829 = vst.msk [vmem:[%s828_s27] sm:$0xff] %vm341_vm1, %v826_v32  ;;  %1729 = vmatmul.mubr.msk.f32.vlgmr.msra.gmra.mrb[4].mxu1 %vm341_vm1, %v826_v32  ;;  %s941_s27 = scalar_lea.vmem [#allocation2], %s1604_s25  ;;  %s1609_s25 = sshll.u32 %s1152_s11, 3 }
 0x894   : > { %1811 = vmatpush3.bf16.msra.mxu1 %v2240_v9  ;;  %1750 = vmatprep.mubr.msk.f32.mxu1 %vm2065_vm0, %v2066_v1  ;;  %v942_v51 = vld [vmem:[%s941_s27] sm:$0xff]  ;;  %s1154_s27 = scalar_lea.vmem [#allocation2], %s1609_s25 }
 0x895   : > { %1812 = vmatprep.subr.bf16.mxu1 %v2064_v0  ;;  %v1155_v23 = vld [vmem:[%s1154_s27] sm:$0xff] }
 0x898   : > { %1814 = vmatpush3.bf16.msra.mxu1 %v2247_v13 }
 0x899   : > { %1821 = vmatprep.subr.bf16.mxu1 %v2064_v0 }
 0x966   : > { %v904_v34 = vpop.f32.mrb[4].mxu1 }
 0x967   : > { %v908_v35 = vadd.f32 %v904_v34, %v835_v33  ;;  %v1730_v36 = vpop.f32.mrb[5].mxu1 }
 0x969   : > { %1917 = vtanh.f32 %v908_v35  ;;  %v909_v38 = vmul.f32 0.5, %v908_v35 }
 0x96b   : > { %1919 = vtanh.f32 %v909_v38 }
 0x973   : > { %v1918_v37 = vpop.eup %1917 }
 0x974   : > { %916 = vrot.lane.b32.xlu1 %v1918_v37, %s2067_s21 }
 0x975   : > { %v1920_v39 = vpop.eup %1919 }
 0x976   : > { %v911_v40 = vmul.f32 0.5, %v1920_v39 }
 0x978   : > { %v912_v41 = vadd.f32 0.5, %v911_v40 }
 0x97a   : > { %v914_v44 = vmul.f32 %v912_v41, %v817_v28 }
 0x9e6   : > { %v917_v42 = vpop.permute.xlu1 %916 }
 0x9e7   : > { %v919_v43 = vmul.f32 %v917_v42, %v912_v41 }
 0x9e9   : > { %921 = vrot.lane.b32.xlu0 %v919_v43, %s2068_s24 }
 0xa5b   : > { %v922_v45 = vpop.permute.xlu0 %921 }
 0xa5c   : > { %v924_v46 = vadd.f32 %v922_v45, %v914_v44 }
 0xa5e   : > { %1921 = vtanh.f32 %v924_v46 }
 0xa68   : > { %v1922_v47 = vpop.eup %1921 }
 0xa69   : > { %927 = vrot.lane.b32.xlu1 %v1922_v47, %s2067_s21 }
 0xadb   : > { %v928_v48 = vpop.permute.xlu1 %927 }
 0xadc   : > { %v930_v49 = vmul.f32 %v928_v48, %v912_v41  ;;  %v1260_v41 = vld [vmem:[%s1259_s6] sm:$0xff] }
 0xade   : > { %932 = vrot.lane.b32.xlu0 %v930_v49, %s2068_s24 }
 0xb50   : > { %v933_v50 = vpop.permute.xlu0 %932 }
 0xb51   : > { %936 = vst.msk [vmem:[%s935_s8] sm:$0xff] %vm341_vm1, %v933_v50  ;;  %1740 = vmatmul.mubr.msk.f32.vlgmr.msra.gmra.mrb[10].mxu0 %vm341_vm1, %v933_v50  ;;  %s1048_s8 = scalar_lea.vmem [#allocation2], %s1607_s7  ;;  %s1389_s7 = sshll.u32 %s2300_s26, 4  ;;  %s2402_s7 = int_to_ptr.vmem [resolvable:$true] %s1389_s7 }
 0xb52   : > { %1817 = vmatpush3.bf16.msra.mxu0 %v2240_v9  ;;  %1761 = vmatprep.mubr.msk.f32.mxu0 %vm2065_vm0, %v2066_v1  ;;  %v1049_v7 = vld [vmem:[%s1048_s8] sm:$0xff]  ;;  %s1620_s8 = sshll.u32 %s2051_s18, 10  ;;  %s2070_s18 = smov [#allocation8]  }
 0xb53   : > { %1818 = vmatprep.subr.bf16.mxu0 %v2064_v0  ;;  %s2410_s11 = scalar_lea.hbm %s2465_s4, %s1620_s8  ;;  %s1981_s13 = sshll.u32 %s2070_s18, 4  ;;  %s1982_s13 = int_to_ptr.vmem [resolvable:$false] %s1981_s13 }
 0xb54   : > { %p1984_p13 = scmp.lt.s32.totalorder %s2402_s7, %s1982_s13 }
 0xb56   : > { %1820 = vmatpush3.bf16.msra.mxu0 %v2247_v13 }
 0xc24   : > { %v1011_v52 = vpop.f32.mrb[10].mxu0 }
 0xc25   : > { %v1015_v53 = vadd.f32 %v1011_v52, %v942_v51  ;;  %v1741_v54 = vpop.f32.mrb[11].mxu0 }
 0xc27   : > { %1923 = vtanh.f32 %v1015_v53  ;;  %v1016_v56 = vmul.f32 0.5, %v1015_v53 }
 0xc29   : > { %1925 = vtanh.f32 %v1016_v56 }
 0xc31   : > { %v1924_v55 = vpop.eup %1923 }
 0xc32   : > { %1023 = vrot.lane.b32.xlu1 %v1924_v55, %s2067_s21 }
 0xc33   : > { %v1926_v57 = vpop.eup %1925 }
 0xc34   : > { %v1018_v58 = vmul.f32 0.5, %v1926_v57 }
 0xc36   : > { %v1019_v59 = vadd.f32 0.5, %v1018_v58 }
 0xc38   : > { %v1021_v62 = vmul.f32 %v1019_v59, %v924_v46 }
 0xca4   : > { %v1024_v60 = vpop.permute.xlu1 %1023 }
 0xca5   : > { %v1026_v61 = vmul.f32 %v1024_v60, %v1019_v59 }
 0xca7   : > { %1028 = vrot.lane.b32.xlu0 %v1026_v61, %s2068_s24 }
 0xd19   : > { %v1029_v63 = vpop.permute.xlu0 %1028 }
 0xd1a   : > { %v1031_v2 = vadd.f32 %v1029_v63, %v1021_v62 }
 0xd1c   : > { %1927 = vtanh.f32 %v1031_v2 }
 0xd26   : > { %v1928_v3 = vpop.eup %1927 }
 0xd27   : > { %1034 = vrot.lane.b32.xlu1 %v1928_v3, %s2067_s21 }
 0xd99   : > { %v1035_v4 = vpop.permute.xlu1 %1034 }
 0xd9a   : > { %v1037_v5 = vmul.f32 %v1035_v4, %v1019_v59 }
 0xd9c   : > { %1039 = vrot.lane.b32.xlu0 %v1037_v5, %s2068_s24 }
 0xe0e   : > { %v1040_v6 = vpop.permute.xlu0 %1039 }
 0xe0f   : > { %1043 = vst.msk [vmem:[%s1042_s12] sm:$0xff] %vm341_vm1, %v1040_v6  ;;  %1751 = vmatmul.mubr.msk.f32.vlgmr.msra.gmra.mrb[6].mxu1 %vm341_vm1, %v1040_v6  ;;  %s1255_s12 = scalar_lea.vmem %s2300_s26, %s1609_s25 [#allocation8]  ;;  %s1977_s25 = scalar_lea.vmem %s2402_s7, 1024 }
 0xe10   : > { %1823 = vmatpush3.bf16.msra.mxu1 %v2240_v9  ;;  %1772 = vmatprep.mubr.msk.f32.mxu1 %vm2065_vm0, %v2066_v1  ;;  %p1978_p8 = scmp.ne.s32.totalorder %s2402_s7, %s1977_s25 }
 0xe11   : > { %1824 = vmatprep.subr.bf16.mxu1 %v2064_v0 }
 0xe12   : > { %p1979_p0 = pnand %p1978_p8, %p2473_p11 }
 0xe14   : > { %1826 = vmatpush3.bf16.msra.mxu1 %v2247_v13  ;;  %p1980_p6 = pneg %p1979_p0 }
 0xee2   : > { %v1118_v8 = vpop.f32.mrb[6].mxu1 }
 0xee3   : > { %v1122_v10 = vadd.f32 %v1118_v8, %v1049_v7  ;;  %v1752_v11 = vpop.f32.mrb[7].mxu1 }
 0xee5   : > { %1929 = vtanh.f32 %v1122_v10  ;;  %v1123_v9 = vmul.f32 0.5, %v1122_v10 }
 0xee7   : > { %1931 = vtanh.f32 %v1123_v9 }
 0xeef   : > { %v1930_v12 = vpop.eup %1929 }
 0xef0   : > { %1130 = vrot.lane.b32.xlu1 %v1930_v12, %s2067_s21 }
 0xef1   : > { %v1932_v1 = vpop.eup %1931 }
 0xef2   : > { %v1125_v0 = vmul.f32 0.5, %v1932_v1 }
 0xef4   : > { %v1126_v14 = vadd.f32 0.5, %v1125_v0 }
 0xef6   : > { %v1128_v16 = vmul.f32 %v1126_v14, %v1031_v2 }
 0xf62   : > { %v1131_v13 = vpop.permute.xlu1 %1130 }
 0xf63   : > { %v1133_v15 = vmul.f32 %v1131_v13, %v1126_v14 }
 0xf65   : > { %1135 = vrot.lane.b32.xlu0 %v1133_v15, %s2068_s24 }
 0xfd7   : > { %v1136_v17 = vpop.permute.xlu0 %1135 }
 0xfd8   : > { %v1138_v18 = vadd.f32 %v1136_v17, %v1128_v16 }
 0xfda   : > { %1933 = vtanh.f32 %v1138_v18 }
 0xfe4   : > { %v1934_v19 = vpop.eup %1933 }
 0xfe5   : > { %1141 = vrot.lane.b32.xlu1 %v1934_v19, %s2067_s21 }
0x1057   : > { %v1142_v20 = vpop.permute.xlu1 %1141 }
0x1058   : > { %v1144_v21 = vmul.f32 %v1142_v20, %v1126_v14 }
0x105a   : > { %1146 = vrot.lane.b32.xlu0 %v1144_v21, %s2068_s24 }
0x10cc   : > { %v1147_v22 = vpop.permute.xlu0 %1146 }
0x10cd   : > { %1150 = vst.msk [vmem:[%s1149_s9] sm:$0xff] %vm341_vm1, %v1147_v22  ;;  %1762 = vmatmul.mubr.msk.f32.vlgmr.msra.gmra.mrb[12].mxu0 %vm341_vm1, %v1147_v22 }
0x11a0   : > { %v1224_v24 = vpop.f32.mrb[12].mxu0 }
0x11a1   : > { %v1228_v25 = vadd.f32 %v1224_v24, %v1155_v23  ;;  %v1763_v26 = vpop.f32.mrb[13].mxu0 }
0x11a3   : > { %1935 = vtanh.f32 %v1228_v25  ;;  %v1229_v28 = vmul.f32 0.5, %v1228_v25 }
0x11a5   : > { %1937 = vtanh.f32 %v1229_v28 }
0x11ad   : > { %v1936_v27 = vpop.eup %1935 }
0x11ae   : > { %1236 = vrot.lane.b32.xlu1 %v1936_v27, %s2067_s21 }
0x11af   : > { %v1938_v29 = vpop.eup %1937 }
0x11b0   : > { %v1231_v30 = vmul.f32 0.5, %v1938_v29 }
0x11b2   : > { %v1232_v31 = vadd.f32 0.5, %v1231_v30 }
0x11b4   : > { %v1234_v34 = vmul.f32 %v1232_v31, %v1138_v18 }
0x1220   : > { %v1237_v32 = vpop.permute.xlu1 %1236 }
0x1221   : > { %v1239_v33 = vmul.f32 %v1237_v32, %v1232_v31 }
0x1223   : > { %1241 = vrot.lane.b32.xlu0 %v1239_v33, %s2068_s24 }
0x1295   : > { %v1242_v35 = vpop.permute.xlu0 %1241 }
0x1296   : > { %v1244_v36 = vadd.f32 %v1242_v35, %v1234_v34 }
0x1298   : > { %1939 = vtanh.f32 %v1244_v36 }
0x12a2   : > { %v1940_v37 = vpop.eup %1939 }
0x12a3   : > { %1247 = vrot.lane.b32.xlu1 %v1940_v37, %s2067_s21 }
0x1315   : > { %v1248_v38 = vpop.permute.xlu1 %1247 }
0x1316   : > { %v1250_v39 = vmul.f32 %v1248_v38, %v1232_v31 }
0x1318   : > { %1252 = vrot.lane.b32.xlu0 %v1250_v39, %s2068_s24 }
0x138a   : > { %v1253_v40 = vpop.permute.xlu0 %1252 }
0x138b   : > { %1256 = vst.msk [vmem:[%s1255_s12] sm:$0xff] %vm341_vm1, %v1253_v40  ;;  %1773 = vmatmul.mubr.msk.f32.vlgmr.msra.gmra.mrb[8].mxu1 %vm341_vm1, %v1253_v40 }
0x145e   : > { %v1329_v42 = vpop.f32.mrb[8].mxu1 }
0x145f   : > { %v1333_v43 = vadd.f32 %v1329_v42, %v1260_v41  ;;  %v1774_v44 = vpop.f32.mrb[9].mxu1 }
0x1461   : > { %1941 = vtanh.f32 %v1333_v43  ;;  %v1334_v46 = vmul.f32 0.5, %v1333_v43 }
0x1463   : > { %1943 = vtanh.f32 %v1334_v46 }
0x146b   : > { %v1942_v45 = vpop.eup %1941 }
0x146c   : > { %1341 = vrot.lane.b32.xlu1 %v1942_v45, %s2067_s21 }
0x146d   : > { %v1944_v47 = vpop.eup %1943 }
0x146e   : > { %v1336_v48 = vmul.f32 0.5, %v1944_v47 }
0x1470   : > { %v1337_v49 = vadd.f32 0.5, %v1336_v48 }
0x1472   : > { %v1339_v52 = vmul.f32 %v1337_v49, %v1244_v36 }
0x14de   : > { %v1342_v50 = vpop.permute.xlu1 %1341 }
0x14df   : > { %v1344_v51 = vmul.f32 %v1342_v50, %v1337_v49 }
0x14e1   : > { %1346 = vrot.lane.b32.xlu0 %v1344_v51, %s2068_s24 }
0x1553   : > { %v1347_v53 = vpop.permute.xlu0 %1346 }
0x1554   : > { %v1349_v54 = vadd.f32 %v1347_v53, %v1339_v52 }
0x1556   : > { %1945 = vtanh.f32 %v1349_v54 }
0x1560   : > { %v1946_v55 = vpop.eup %1945 }
0x1561   : > { %1352 = vrot.lane.b32.xlu1 %v1946_v55, %s2067_s21  ;;  %s1360_s21 = scalar_lea.vmem %s2300_s26, %s1611_s14 [#allocation8]  ;;  %s1983_s26 = scalar_lea.vmem %s1982_s13, 2048 }
0x1562   : > { %p1985_p2 = scmp.lt.s32.totalorder %s1983_s26, %s1977_s25 }
0x1564   : > { %p1986_p5 = por %p1985_p2, %p1984_p13 }
0x1565   : > { %1364 = vrot.lane.b32.xlu1 %v1349_v54, %s2069_s5 }
0x1566   : > { %p1987_p4 = pnand %p1986_p5, %p1980_p6 }
0x15d3   : > { %v1353_v56 = vpop.permute.xlu1 %1352 }
0x15d4   : > { %v1355_v57 = vmul.f32 %v1353_v56, %v1337_v49 }
0x15d6   : > { %1357 = vrot.lane.b32.xlu0 %v1355_v57, %s2068_s24  ;;  %s1369_s24 = scalar_lea.sflag [#allocation7], %s2210_s22 }
0x15d7   : > { %v1365_v58 = vpop.permute.xlu1 %1364 }
0x15d8   : > { %1367 = vst.msk [vmem:[#allocation4] sm:$0xff] %vm341_vm1, %v1365_v58 }
0x1648   : > { %v1358_v59 = vpop.permute.xlu0 %1357 }
0x1649   : > { %1361 = vst.msk [vmem:[%s1360_s21] sm:$0xff] %vm341_vm1, %v1358_v59  ;;  %1362 = vst.msk [vmem:[#allocation3] sm:$0xff] %vm341_vm1, %v1358_v59 }
0x164a   : > { %1990 = shalt.err (!%p1987_p4)
}
0x164b   : > { %s1991_s27 = scalar_lea.hbm %s2410_s11, 1024  ;;  %s1995_s6 = scalar_lea.hbm %s2465_s4, 2048 }
0x164c   : > { %p1992_p7 = scmp.ne.s32.totalorder %s2410_s11, %s1991_s27  ;;  %p1996_p1 = scmp.lt.u32.totalorder %s2410_s11, %s2465_s4 }
0x164d   : > { %p1997_p3 = scmp.lt.u32.totalorder %s1995_s6, %s1991_s27  ;;  %p1999_p8 = scmp.lt.u32.totalorder %s1991_s27, %s2410_s11 }
0x164e   : > { %p1993_p10 = pnand %p1992_p7, %p2473_p11 }
0x164f   : > { %p1998_p9 = por %p1997_p3, %p1996_p1 }
0x1650   : > { %p1994_p12 = pneg %p1993_p10 }
0x1651   : > { %p2000_p0 = por %p1999_p8, %p1998_p9 }
0x1653   : > { %p2001_p6 = pnand %p2000_p0, %p1994_p12 }
0x1655   : > { %2004 = shalt.err (!%p2001_p6)
}
0x1656   : > { %s2071_s21 = smov 128   ;;  %s2072_s9 = smov 8  }
0x1657   : > { %1829 = dma.vmem_to_hbm [thread:$0]  (%p2473_p11), %s2402_s7, 1024, %s2410_s11, %s1369_s24, %s2071_s21, %s2071_s21, %s2072_s9  }
0x1658 PF: > { %s1404_s10 = sand.u32 1, %s2039_s15   ;;  %p2474_p13 = scmp.ne.s32.totalorder %s2470_s30, 0 }
0x1659   : > { %p2475_p2 = scmp.ge.s32.totalorder %s2059_s20, 2  ;;  %s1405_s25 = scalar_lea.sflag [#allocation7], %s1404_s10 }
0x165b   : > { %p1836_p5 = pnand %p2475_p2, %p2474_p13 }
0x165d   : > { %2034 = dma.done.wait (!%p1836_p5), %s1405_s25, 1024  }
0x165e   : > { %2036 = vsyncadd (!%p1836_p5), %s1405_s25, 4294966272  ;;  %s20_s20 = sadd.s32 1, %s2059_s20   ;;  %s2476_s15 = smov %s2043_s16 }
0x165f   : > { %p17_p4 = scmp.ge.s32.totalorder %s20_s20, 4   ;;  %s2477_s16 = smov %s2047_s17 }
0x1660   : > { %s2478_s17 = smov %s2154_s29  ;;  %s2479_s18 = smov %s2055_s19 }
0x1661   : > { %s2480_s19 = smov %s2482_s23  ;;  %19 = sbr.rel (!%p17_p4) target bundleno = 6 (0x6), region = 110 }
0x1668   :  { %1410 = vsyncpa [#allocation6], 1 }
0x1669   :  { %1412 = vsyncpa [#allocation6 + $0x1], 1 }
0x166a   :  { %1413 = vsyncpa [#allocation7], 1 }
0x166b   :  { %1415 = vsyncpa [#allocation7 + $0x1], 1 }

</bundles_post_ra>
